<compile_context>
chip_gen: v7x
topology: tpu7x:2x2x1
jax: 0.10.0
libtpu: 0.0.40
codegen_flags: <defaults>
</compile_context>

<pallas_src>
import jax
import jax.numpy as jnp
from jax.experimental import pallas as pl
from jax.experimental.pallas import tpu as pltpu


# ----------------------------- fused kernel -------------------------------

def make_decoder_kernel(num_layers, hidden_size):
    H = hidden_size

    def kernel(*refs):
        tok_ref, emb_ref, h_in_ref, c_in_ref = refs[:4]
        lstm_refs = refs[4:4 + 2 * num_layers]                  # w0, b0, w1, b1, ...
        fc_w_ref, fc_b_ref = refs[4 + 2 * num_layers:6 + 2 * num_layers]
        preds_ref, h_out_ref, c_out_ref, h_top_ref = refs[6 + 2 * num_layers:]

        j = pl.program_id(0)                                    # vocab tile index

        # Embedding gather + LSTM stack run once (first vocab tile); the
        # top-layer h is carried across vocab tiles in VMEM scratch.
        @pl.when(j == 0)
        def _lstm_step():
            B = tok_ref.shape[0]
            vocab = emb_ref.shape[0]
            # In-kernel embedding gather as one-hot @ table (MXU); exact
            # (picks the bf16 rows).
            # TODO(synk): at realistic vocab sizes replace the one-hot matmul
            # with a scalar-prefetch / manual-DMA row gather.
            ids = tok_ref[...]                                            # (B, 1) i32
            iota = jax.lax.broadcasted_iota(jnp.int32, (B, vocab), 1)
            one_hot = (iota == ids).astype(emb_ref.dtype)                 # (B, vocab)
            x = jnp.dot(one_hot, emb_ref[...],
                        preferred_element_type=jnp.float32)               # (B, E) f32
            # TODO(synk): nn.Dropout / LSTM inter-layer dropout are identity in
            # eval mode (p ignored).
            for layer in range(num_layers):
                w_ref = lstm_refs[2 * layer]
                b_ref = lstm_refs[2 * layer + 1]
                h_prev = h_in_ref[layer]                                  # (B, H) f32
                c_prev = c_in_ref[layer]                                  # (B, H) f32
                # Single MXU push per layer: gates = [x | h] @ [[W_ih],[W_hh]] + b
                xh = jnp.concatenate(
                    [x.astype(w_ref.dtype), h_prev.astype(w_ref.dtype)], axis=-1)
                gates = jnp.dot(xh, w_ref[...],
                                preferred_element_type=jnp.float32) + b_ref[...]
                # PyTorch gate order i, f, g, o; slices fall on 128-lane bounds.
                i_g = jax.nn.sigmoid(gates[:, 0 * H:1 * H])
                f_g = jax.nn.sigmoid(gates[:, 1 * H:2 * H])
                g_g = jnp.tanh(gates[:, 2 * H:3 * H])
                o_g = jax.nn.sigmoid(gates[:, 3 * H:4 * H])
                c_new = f_g * c_prev + i_g * g_g
                h_new = o_g * jnp.tanh(c_new)
                h_out_ref[layer] = h_new
                c_out_ref[layer] = c_new
                x = h_new
            h_top_ref[...] = x

        # FC (vocab projection), 128-lane-dense tile of V; runs every grid step.
        preds_ref[...] = (
            jnp.dot(h_top_ref[...].astype(fc_w_ref.dtype), fc_w_ref[...],
                    preferred_element_type=jnp.float32)
            + fc_b_ref[...]).astype(preds_ref.dtype)

    return kernel


# ----------------------------- module wrapper ------------------------------

def init_decoder_params(key, input_size, embedding_size, hidden_size,
                        num_layers, output_size, param_dtype=jnp.bfloat16):
    keys = jax.random.split(key, 3 + num_layers)
    scale = hidden_size ** -0.5
    params = {
        "embedding": (jax.random.normal(
            keys[0], (input_size, embedding_size), jnp.float32) * 0.1
            ).astype(param_dtype),
        "fc_w": jax.random.uniform(
            keys[1], (hidden_size, output_size), jnp.float32,
            -scale, scale).astype(param_dtype),
        "fc_b": jax.random.uniform(
            keys[2], (1, output_size), jnp.float32, -scale, scale),
        "lstm": [],
    }
    for layer in range(num_layers):
        in_dim = embedding_size if layer == 0 else hidden_size
        k_w, k_b = jax.random.split(keys[3 + layer], 2)
        params["lstm"].append({
            # [W_ih^T ; W_hh^T] pre-concatenated along K -> (in_dim + H, 4H)
            "w": jax.random.uniform(
                k_w, (in_dim + hidden_size, 4 * hidden_size), jnp.float32,
                -scale, scale).astype(param_dtype),
            # b = b_ih + b_hh folded, kept f32
            "b": jax.random.uniform(
                k_b, (1, 4 * hidden_size), jnp.float32, -scale, scale),
        })
    return params


@jax.jit
def decoder_rnn_forward(params, x_tokens, hidden, cell):
    """x_tokens: (B,) int32; hidden/cell: (L, B, H) f32 -> (preds, hidden, cell)."""
    B = x_tokens.shape[0]
    L, _, H = hidden.shape
    vocab, E = params["embedding"].shape
    V = params["fc_w"].shape[1]
    TV = min(128, V)                                   # lane-dense vocab tile
    assert V % TV == 0 and B % 8 == 0 and H % 128 == 0 and E % 128 == 0

    def whole(shape):
        return pl.BlockSpec(shape, lambda j, _n=len(shape): (0,) * _n)

    tok = x_tokens.reshape(B, 1).astype(jnp.int32)
    inputs = [tok, params["embedding"], hidden, cell]
    in_specs = [whole((B, 1)), whole((vocab, E)),
                whole((L, B, H)), whole((L, B, H))]
    flops = 2 * B * vocab * E
    for lp in params["lstm"]:
        inputs += [lp["w"], lp["b"]]
        in_specs += [whole(lp["w"].shape), whole(lp["b"].shape)]
        flops += 2 * B * lp["w"].shape[0] * lp["w"].shape[1]
    inputs += [params["fc_w"], params["fc_b"]]
    in_specs += [pl.BlockSpec((H, TV), lambda j: (0, j)),
                 pl.BlockSpec((1, TV), lambda j: (0, j))]
    flops += 2 * B * H * V

    out_shape = (jax.ShapeDtypeStruct((B, V), jnp.float32),
                 jax.ShapeDtypeStruct((L, B, H), jnp.float32),
                 jax.ShapeDtypeStruct((L, B, H), jnp.float32))
    out_specs = (pl.BlockSpec((B, TV), lambda j: (0, j)),
                 whole((L, B, H)), whole((L, B, H)))

    bytes_accessed = int(sum(x.size * x.dtype.itemsize for x in inputs)
                         + 4 * (B * V + 2 * L * B * H))
    cost = pl.CostEstimate(flops=int(flops),
                           transcendentals=int(5 * L * B * H),
                           bytes_accessed=bytes_accessed)

    # TODO(synk): an autoregressive decode loop should move the time axis into
    # the grid (weights stay VMEM-resident, state via input_output_aliases).
    return pl.pallas_call(
        make_decoder_kernel(L, H),
        out_shape=out_shape,
        grid_spec=pltpu.PrefetchScalarGridSpec(
            num_scalar_prefetch=0,
            grid=(V // TV,),
            in_specs=in_specs,
            out_specs=out_specs,
            scratch_shapes=[pltpu.VMEM((B, H), jnp.float32)]),
        # "arbitrary": the top-layer h scratch is carried across vocab tiles
        # (would need per-core recompute to mark "parallel" on v7x megacore).
        compiler_params=pltpu.CompilerParams(dimension_semantics=("arbitrary",)),
        cost_estimate=cost,
    )(*inputs)


# ----------------------------- pure-JAX reference --------------------------

def reference_forward(params, x_tokens, hidden, cell):
    H = hidden.shape[-1]
    x = params["embedding"].astype(jnp.float32)[x_tokens]
    new_h, new_c = [], []
    for layer, lp in enumerate(params["lstm"]):
        xh = jnp.concatenate([x, hidden[layer]], axis=-1)
        gates = xh @ lp["w"].astype(jnp.float32) + lp["b"]
        i_g = jax.nn.sigmoid(gates[:, 0 * H:1 * H])
        f_g = jax.nn.sigmoid(gates[:, 1 * H:2 * H])
        g_g = jnp.tanh(gates[:, 2 * H:3 * H])
        o_g = jax.nn.sigmoid(gates[:, 3 * H:4 * H])
        c_new = f_g * cell[layer] + i_g * g_g
        h_new = o_g * jnp.tanh(c_new)
        new_h.append(h_new)
        new_c.append(c_new)
        x = h_new
    preds = x @ params["fc_w"].astype(jnp.float32) + params["fc_b"]
    return preds, jnp.stack(new_h), jnp.stack(new_c)


# --------------------------------- demo ------------------------------------

if __name__ == "__main__":
    # Small but sublane/lane-dense shapes consistent with the module.
    B = 8          # batch (multiple of 8 sublanes)
    VOCAB = 256    # input_size == output_size (multiple of 128 lanes)
    E = 128        # embedding_size
    H = 128        # hidden_size
    L = 2          # num_layers

    key = jax.random.PRNGKey(0)
    k_params, k_tok, k_h, k_c = jax.random.split(key, 4)

    params = init_decoder_params(k_params, VOCAB, E, H, L, VOCAB)
    x_tokens = jax.random.randint(k_tok, (B,), 0, VOCAB, dtype=jnp.int32)
    hidden = jax.random.normal(k_h, (L, B, H), jnp.float32)
    cell = jax.random.normal(k_c, (L, B, H), jnp.float32)

    preds, h_out, c_out = decoder_rnn_forward(params, x_tokens, hidden, cell)
    jax.block_until_ready((preds, h_out, c_out))

    assert preds.shape == (B, VOCAB) and preds.dtype == jnp.float32
    assert h_out.shape == (L, B, H) and c_out.shape == (L, B, H)

    ref_p, ref_h, ref_c = reference_forward(params, x_tokens, hidden, cell)
    assert float(jnp.max(jnp.abs(preds - ref_p))) < 5e-2
    assert float(jnp.max(jnp.abs(h_out - ref_h))) < 5e-2
    assert float(jnp.max(jnp.abs(c_out - ref_c))) < 5e-2

    print("KERNEL_OK")
</pallas_src>

<mosaic_0001>
module attributes {stable_mosaic.version = 11 : i64} {
  func.func @kernel(%arg0: i32, %arg1: memref<8x1xi32, #tpu.memory_space<vmem>>, %arg2: memref<256x128xbf16, #tpu.memory_space<vmem>>, %arg3: memref<2x8x128xf32, #tpu.memory_space<vmem>>, %arg4: memref<2x8x128xf32, #tpu.memory_space<vmem>>, %arg5: memref<256x512xbf16, #tpu.memory_space<vmem>>, %arg6: memref<1x512xf32, #tpu.memory_space<vmem>>, %arg7: memref<256x512xbf16, #tpu.memory_space<vmem>>, %arg8: memref<1x512xf32, #tpu.memory_space<vmem>>, %arg9: memref<128x128xbf16, #tpu.memory_space<vmem>>, %arg10: memref<1x128xf32, #tpu.memory_space<vmem>>, %arg11: memref<8x128xf32, #tpu.memory_space<vmem>>, %arg12: memref<2x8x128xf32, #tpu.memory_space<vmem>>, %arg13: memref<2x8x128xf32, #tpu.memory_space<vmem>>, %arg14: memref<8x128xf32, #tpu.memory_space<vmem>>) attributes {dimension_semantics = [#tpu.dimension_semantics<arbitrary>], iteration_bounds = array<i64: 2>, scalar_prefetch = 0 : i64, scratch_operands = 1 : i64, tpu.core_type = #tpu.core_type<tc>, window_params = [{pipeline_mode = #tpu.pipeline_mode<synchronous>, transform_indices = @transform_0, window_bounds = array<i64: 8, 1>}, {pipeline_mode = #tpu.pipeline_mode<synchronous>, transform_indices = @transform_1, window_bounds = array<i64: 256, 128>}, {pipeline_mode = #tpu.pipeline_mode<synchronous>, transform_indices = @transform_2, window_bounds = array<i64: 2, 8, 128>}, {pipeline_mode = #tpu.pipeline_mode<synchronous>, transform_indices = @transform_3, window_bounds = array<i64: 2, 8, 128>}, {pipeline_mode = #tpu.pipeline_mode<synchronous>, transform_indices = @transform_4, window_bounds = array<i64: 256, 512>}, {pipeline_mode = #tpu.pipeline_mode<synchronous>, transform_indices = @transform_5, window_bounds = array<i64: 1, 512>}, {pipeline_mode = #tpu.pipeline_mode<synchronous>, transform_indices = @transform_6, window_bounds = array<i64: 256, 512>}, {pipeline_mode = #tpu.pipeline_mode<synchronous>, transform_indices = @transform_7, window_bounds = array<i64: 1, 512>}, {transform_indices = @transform_8, window_bounds = array<i64: 128, 128>}, {transform_indices = @transform_9, window_bounds = array<i64: 1, 128>}, {transform_indices = @transform_10, window_bounds = array<i64: 8, 128>}, {pipeline_mode = #tpu.pipeline_mode<synchronous>, transform_indices = @transform_11, window_bounds = array<i64: 2, 8, 128>}, {pipeline_mode = #tpu.pipeline_mode<synchronous>, transform_indices = @transform_12, window_bounds = array<i64: 2, 8, 128>}]} {
    %c0_i32 = arith.constant 0 : i32
    %0 = arith.cmpi eq, %arg0, %c0_i32 : i32
    %1 = arith.extui %0 : i1 to i32
    %c0_i32_0 = arith.constant 0 : i32
    %2 = arith.cmpi ne, %1, %c0_i32_0 : i32
    scf.if %2 {
      %c0_8 = arith.constant 0 : index
      %c0_9 = arith.constant 0 : index
      %11 = vector.load %arg1[%c0_8, %c0_9] : memref<8x1xi32, #tpu.memory_space<vmem>>, vector<8x1xi32>
      %12 = tpu.iota {dimensions = array<i32: 1>} : vector<8x256xi32>
      %13 = vector.broadcast %11 : vector<8x1xi32> to vector<8x256xi32>
      %14 = arith.cmpi eq, %12, %13 : vector<8x256xi32>
      %15 = arith.extui %14 : vector<8x256xi1> to vector<8x256xi32>
      %16 = arith.sitofp %15 : vector<8x256xi32> to vector<8x256xf32>
      %17 = arith.truncf %16 : vector<8x256xf32> to vector<8x256xbf16>
      %c0_10 = arith.constant 0 : index
      %c0_11 = arith.constant 0 : index
      %18 = vector.load %arg2[%c0_10, %c0_11] : memref<256x128xbf16, #tpu.memory_space<vmem>>, vector<256x128xbf16>
      %cst_12 = arith.constant dense<0.000000e+00> : vector<8x128xf32>
      %19 = tpu.matmul %17, %18, %cst_12 {dimension_numbers = #tpu.dot_dimension_numbers<[1], [0], [0], [1], [0, 0, 1, 1], [], []>} : vector<8x256xbf16>, vector<256x128xbf16>, vector<8x128xf32> -> vector<8x128xf32>
      %c0_13 = arith.constant 0 : index
      %c0_14 = arith.constant 0 : index
      %c0_15 = arith.constant 0 : index
      %20 = vector.load %arg3[%c0_13, %c0_14, %c0_15] : memref<2x8x128xf32, #tpu.memory_space<vmem>>, vector<1x8x128xf32>
      %21 = vector.shape_cast %20 : vector<1x8x128xf32> to vector<8x128xf32>
      %c0_16 = arith.constant 0 : index
      %c0_17 = arith.constant 0 : index
      %c0_18 = arith.constant 0 : index
      %22 = vector.load %arg4[%c0_16, %c0_17, %c0_18] : memref<2x8x128xf32, #tpu.memory_space<vmem>>, vector<1x8x128xf32>
      %23 = vector.shape_cast %22 : vector<1x8x128xf32> to vector<8x128xf32>
      %24 = arith.truncf %19 : vector<8x128xf32> to vector<8x128xbf16>
      %25 = arith.truncf %21 : vector<8x128xf32> to vector<8x128xbf16>
      %26 = tpu.concatenate %24, %25 in 1 : vector<8x128xbf16>, vector<8x128xbf16> -> vector<8x256xbf16>
      %c0_19 = arith.constant 0 : index
      %c0_20 = arith.constant 0 : index
      %27 = vector.load %arg5[%c0_19, %c0_20] : memref<256x512xbf16, #tpu.memory_space<vmem>>, vector<256x512xbf16>
      %cst_21 = arith.constant dense<0.000000e+00> : vector<8x512xf32>
      %28 = tpu.matmul %26, %27, %cst_21 {dimension_numbers = #tpu.dot_dimension_numbers<[1], [0], [0], [1], [0, 0, 1, 1], [], []>} : vector<8x256xbf16>, vector<256x512xbf16>, vector<8x512xf32> -> vector<8x512xf32>
      %c0_22 = arith.constant 0 : index
      %c0_23 = arith.constant 0 : index
      %29 = vector.load %arg6[%c0_22, %c0_23] : memref<1x512xf32, #tpu.memory_space<vmem>>, vector<1x512xf32>
      %30 = vector.broadcast %29 : vector<1x512xf32> to vector<8x512xf32>
      %31 = arith.addf %28, %30 : vector<8x512xf32>
      %32 = vector.extract_strided_slice %31 {offsets = [0, 0], sizes = [8, 128], strides = [1, 1]} : vector<8x512xf32> to vector<8x128xf32>
      %33 = arith.negf %32 : vector<8x128xf32>
      %34 = math.exp %33 : vector<8x128xf32>
      %cst_24 = arith.constant 1.000000e+00 : f32
      %35 = vector.broadcast %cst_24 : f32 to vector<8x128xf32>
      %36 = arith.addf %35, %34 : vector<8x128xf32>
      %37 = arith.divf %35, %36 : vector<8x128xf32>
      %38 = vector.extract_strided_slice %31 {offsets = [0, 128], sizes = [8, 128], strides = [1, 1]} : vector<8x512xf32> to vector<8x128xf32>
      %39 = arith.negf %38 : vector<8x128xf32>
      %40 = math.exp %39 : vector<8x128xf32>
      %cst_25 = arith.constant 1.000000e+00 : f32
      %41 = vector.broadcast %cst_25 : f32 to vector<8x128xf32>
      %42 = arith.addf %41, %40 : vector<8x128xf32>
      %43 = arith.divf %41, %42 : vector<8x128xf32>
      %44 = vector.extract_strided_slice %31 {offsets = [0, 256], sizes = [8, 128], strides = [1, 1]} : vector<8x512xf32> to vector<8x128xf32>
      %45 = math.tanh %44 : vector<8x128xf32>
      %46 = vector.extract_strided_slice %31 {offsets = [0, 384], sizes = [8, 128], strides = [1, 1]} : vector<8x512xf32> to vector<8x128xf32>
      %47 = arith.negf %46 : vector<8x128xf32>
      %48 = math.exp %47 : vector<8x128xf32>
      %cst_26 = arith.constant 1.000000e+00 : f32
      %49 = vector.broadcast %cst_26 : f32 to vector<8x128xf32>
      %50 = arith.addf %49, %48 : vector<8x128xf32>
      %51 = arith.divf %49, %50 : vector<8x128xf32>
      %52 = arith.mulf %43, %23 : vector<8x128xf32>
      %53 = arith.mulf %37, %45 : vector<8x128xf32>
      %54 = arith.addf %52, %53 : vector<8x128xf32>
      %55 = math.tanh %54 : vector<8x128xf32>
      %56 = arith.mulf %51, %55 : vector<8x128xf32>
      %c0_27 = arith.constant 0 : index
      %c0_28 = arith.constant 0 : index
      %c0_29 = arith.constant 0 : index
      %57 = vector.load %arg12[%c0_27, %c0_28, %c0_29] : memref<2x8x128xf32, #tpu.memory_space<vmem>>, vector<1x8x128xf32>
      %58 = vector.shape_cast %57 : vector<1x8x128xf32> to vector<8x128xf32>
      %59 = vector.shape_cast %56 : vector<8x128xf32> to vector<1x8x128xf32>
      tpu.vector_store %arg12[%c0_27, %c0_28, %c0_29], %59 {strides = array<i32>} : memref<2x8x128xf32, #tpu.memory_space<vmem>>, vector<1x8x128xf32>,
      %c0_30 = arith.constant 0 : index
      %c0_31 = arith.constant 0 : index
      %c0_32 = arith.constant 0 : index
      %60 = vector.load %arg13[%c0_30, %c0_31, %c0_32] : memref<2x8x128xf32, #tpu.memory_space<vmem>>, vector<1x8x128xf32>
      %61 = vector.shape_cast %60 : vector<1x8x128xf32> to vector<8x128xf32>
      %62 = vector.shape_cast %54 : vector<8x128xf32> to vector<1x8x128xf32>
      tpu.vector_store %arg13[%c0_30, %c0_31, %c0_32], %62 {strides = array<i32>} : memref<2x8x128xf32, #tpu.memory_space<vmem>>, vector<1x8x128xf32>,
      %c1 = arith.constant 1 : index
      %c0_33 = arith.constant 0 : index
      %c0_34 = arith.constant 0 : index
      %63 = vector.load %arg3[%c1, %c0_33, %c0_34] : memref<2x8x128xf32, #tpu.memory_space<vmem>>, vector<1x8x128xf32>
      %64 = vector.shape_cast %63 : vector<1x8x128xf32> to vector<8x128xf32>
      %c1_35 = arith.constant 1 : index
      %c0_36 = arith.constant 0 : index
      %c0_37 = arith.constant 0 : index
      %65 = vector.load %arg4[%c1_35, %c0_36, %c0_37] : memref<2x8x128xf32, #tpu.memory_space<vmem>>, vector<1x8x128xf32>
      %66 = vector.shape_cast %65 : vector<1x8x128xf32> to vector<8x128xf32>
      %67 = arith.truncf %56 : vector<8x128xf32> to vector<8x128xbf16>
      %68 = arith.truncf %64 : vector<8x128xf32> to vector<8x128xbf16>
      %69 = tpu.concatenate %67, %68 in 1 : vector<8x128xbf16>, vector<8x128xbf16> -> vector<8x256xbf16>
      %c0_38 = arith.constant 0 : index
      %c0_39 = arith.constant 0 : index
      %70 = vector.load %arg7[%c0_38, %c0_39] : memref<256x512xbf16, #tpu.memory_space<vmem>>, vector<256x512xbf16>
      %cst_40 = arith.constant dense<0.000000e+00> : vector<8x512xf32>
      %71 = tpu.matmul %69, %70, %cst_40 {dimension_numbers = #tpu.dot_dimension_numbers<[1], [0], [0], [1], [0, 0, 1, 1], [], []>} : vector<8x256xbf16>, vector<256x512xbf16>, vector<8x512xf32> -> vector<8x512xf32>
      %c0_41 = arith.constant 0 : index
      %c0_42 = arith.constant 0 : index
      %72 = vector.load %arg8[%c0_41, %c0_42] : memref<1x512xf32, #tpu.memory_space<vmem>>, vector<1x512xf32>
      %73 = vector.broadcast %72 : vector<1x512xf32> to vector<8x512xf32>
      %74 = arith.addf %71, %73 : vector<8x512xf32>
      %75 = vector.extract_strided_slice %74 {offsets = [0, 0], sizes = [8, 128], strides = [1, 1]} : vector<8x512xf32> to vector<8x128xf32>
      %76 = arith.negf %75 : vector<8x128xf32>
      %77 = math.exp %76 : vector<8x128xf32>
      %cst_43 = arith.constant 1.000000e+00 : f32
      %78 = vector.broadcast %cst_43 : f32 to vector<8x128xf32>
      %79 = arith.addf %78, %77 : vector<8x128xf32>
      %80 = arith.divf %78, %79 : vector<8x128xf32>
      %81 = vector.extract_strided_slice %74 {offsets = [0, 128], sizes = [8, 128], strides = [1, 1]} : vector<8x512xf32> to vector<8x128xf32>
      %82 = arith.negf %81 : vector<8x128xf32>
      %83 = math.exp %82 : vector<8x128xf32>
      %cst_44 = arith.constant 1.000000e+00 : f32
      %84 = vector.broadcast %cst_44 : f32 to vector<8x128xf32>
      %85 = arith.addf %84, %83 : vector<8x128xf32>
      %86 = arith.divf %84, %85 : vector<8x128xf32>
      %87 = vector.extract_strided_slice %74 {offsets = [0, 256], sizes = [8, 128], strides = [1, 1]} : vector<8x512xf32> to vector<8x128xf32>
      %88 = math.tanh %87 : vector<8x128xf32>
      %89 = vector.extract_strided_slice %74 {offsets = [0, 384], sizes = [8, 128], strides = [1, 1]} : vector<8x512xf32> to vector<8x128xf32>
      %90 = arith.negf %89 : vector<8x128xf32>
      %91 = math.exp %90 : vector<8x128xf32>
      %cst_45 = arith.constant 1.000000e+00 : f32
      %92 = vector.broadcast %cst_45 : f32 to vector<8x128xf32>
      %93 = arith.addf %92, %91 : vector<8x128xf32>
      %94 = arith.divf %92, %93 : vector<8x128xf32>
      %95 = arith.mulf %86, %66 : vector<8x128xf32>
      %96 = arith.mulf %80, %88 : vector<8x128xf32>
      %97 = arith.addf %95, %96 : vector<8x128xf32>
      %98 = math.tanh %97 : vector<8x128xf32>
      %99 = arith.mulf %94, %98 : vector<8x128xf32>
      %c1_46 = arith.constant 1 : index
      %c0_47 = arith.constant 0 : index
      %c0_48 = arith.constant 0 : index
      %100 = vector.load %arg12[%c1_46, %c0_47, %c0_48] : memref<2x8x128xf32, #tpu.memory_space<vmem>>, vector<1x8x128xf32>
      %101 = vector.shape_cast %100 : vector<1x8x128xf32> to vector<8x128xf32>
      %102 = vector.shape_cast %99 : vector<8x128xf32> to vector<1x8x128xf32>
      tpu.vector_store %arg12[%c1_46, %c0_47, %c0_48], %102 {strides = array<i32>} : memref<2x8x128xf32, #tpu.memory_space<vmem>>, vector<1x8x128xf32>,
      %c1_49 = arith.constant 1 : index
      %c0_50 = arith.constant 0 : index
      %c0_51 = arith.constant 0 : index
      %103 = vector.load %arg13[%c1_49, %c0_50, %c0_51] : memref<2x8x128xf32, #tpu.memory_space<vmem>>, vector<1x8x128xf32>
      %104 = vector.shape_cast %103 : vector<1x8x128xf32> to vector<8x128xf32>
      %105 = vector.shape_cast %97 : vector<8x128xf32> to vector<1x8x128xf32>
      tpu.vector_store %arg13[%c1_49, %c0_50, %c0_51], %105 {strides = array<i32>} : memref<2x8x128xf32, #tpu.memory_space<vmem>>, vector<1x8x128xf32>,
      %c0_52 = arith.constant 0 : index
      %c0_53 = arith.constant 0 : index
      %106 = vector.load %arg14[%c0_52, %c0_53] : memref<8x128xf32, #tpu.memory_space<vmem>>, vector<8x128xf32>
      tpu.vector_store %arg14[%c0_52, %c0_53], %99 {strides = array<i32>} : memref<8x128xf32, #tpu.memory_space<vmem>>, vector<8x128xf32>,
    } else {
    }
    %c0 = arith.constant 0 : index
    %c0_1 = arith.constant 0 : index
    %3 = vector.load %arg14[%c0, %c0_1] : memref<8x128xf32, #tpu.memory_space<vmem>>, vector<8x128xf32>
    %4 = arith.truncf %3 : vector<8x128xf32> to vector<8x128xbf16>
    %c0_2 = arith.constant 0 : index
    %c0_3 = arith.constant 0 : index
    %5 = vector.load %arg9[%c0_2, %c0_3] : memref<128x128xbf16, #tpu.memory_space<vmem>>, vector<128x128xbf16>
    %cst = arith.constant dense<0.000000e+00> : vector<8x128xf32>
    %6 = tpu.matmul %4, %5, %cst {dimension_numbers = #tpu.dot_dimension_numbers<[1], [0], [0], [1], [0, 0, 1, 1], [], []>} : vector<8x128xbf16>, vector<128x128xbf16>, vector<8x128xf32> -> vector<8x128xf32>
    %c0_4 = arith.constant 0 : index
    %c0_5 = arith.constant 0 : index
    %7 = vector.load %arg10[%c0_4, %c0_5] : memref<1x128xf32, #tpu.memory_space<vmem>>, vector<1x128xf32>
    %8 = vector.broadcast %7 : vector<1x128xf32> to vector<8x128xf32>
    %9 = arith.addf %6, %8 : vector<8x128xf32>
    %c0_6 = arith.constant 0 : index
    %c0_7 = arith.constant 0 : index
    %10 = vector.load %arg11[%c0_6, %c0_7] : memref<8x128xf32, #tpu.memory_space<vmem>>, vector<8x128xf32>
    tpu.vector_store %arg11[%c0_6, %c0_7], %9 {strides = array<i32>} : memref<8x128xf32, #tpu.memory_space<vmem>>, vector<8x128xf32>,
    return
  }
  func.func @transform_0(%arg0: i32) -> (i32, i32) {
    %c0_i32 = arith.constant 0 : i32
    %c0_i32_0 = arith.constant 0 : i32
    %c0_i32_1 = arith.constant 0 : i32
    return %c0_i32, %c0_i32_0 : i32, i32
  }
  func.func @transform_1(%arg0: i32) -> (i32, i32) {
    %c0_i32 = arith.constant 0 : i32
    %c0_i32_0 = arith.constant 0 : i32
    %c0_i32_1 = arith.constant 0 : i32
    return %c0_i32, %c0_i32_0 : i32, i32
  }
  func.func @transform_2(%arg0: i32) -> (i32, i32, i32) {
    %c0_i32 = arith.constant 0 : i32
    %c0_i32_0 = arith.constant 0 : i32
    %c0_i32_1 = arith.constant 0 : i32
    %c0_i32_2 = arith.constant 0 : i32
    return %c0_i32, %c0_i32_0, %c0_i32_1 : i32, i32, i32
  }
  func.func @transform_3(%arg0: i32) -> (i32, i32, i32) {
    %c0_i32 = arith.constant 0 : i32
    %c0_i32_0 = arith.constant 0 : i32
    %c0_i32_1 = arith.constant 0 : i32
    %c0_i32_2 = arith.constant 0 : i32
    return %c0_i32, %c0_i32_0, %c0_i32_1 : i32, i32, i32
  }
  func.func @transform_4(%arg0: i32) -> (i32, i32) {
    %c0_i32 = arith.constant 0 : i32
    %c0_i32_0 = arith.constant 0 : i32
    %c0_i32_1 = arith.constant 0 : i32
    return %c0_i32, %c0_i32_0 : i32, i32
  }
  func.func @transform_5(%arg0: i32) -> (i32, i32) {
    %c0_i32 = arith.constant 0 : i32
    %c0_i32_0 = arith.constant 0 : i32
    %c0_i32_1 = arith.constant 0 : i32
    return %c0_i32, %c0_i32_0 : i32, i32
  }
  func.func @transform_6(%arg0: i32) -> (i32, i32) {
    %c0_i32 = arith.constant 0 : i32
    %c0_i32_0 = arith.constant 0 : i32
    %c0_i32_1 = arith.constant 0 : i32
    return %c0_i32, %c0_i32_0 : i32, i32
  }
  func.func @transform_7(%arg0: i32) -> (i32, i32) {
    %c0_i32 = arith.constant 0 : i32
    %c0_i32_0 = arith.constant 0 : i32
    %c0_i32_1 = arith.constant 0 : i32
    return %c0_i32, %c0_i32_0 : i32, i32
  }
  func.func @transform_8(%arg0: i32) -> (i32, i32) {
    %c0_i32 = arith.constant 0 : i32
    %c0_i32_0 = arith.constant 0 : i32
    return %c0_i32, %arg0 : i32, i32
  }
  func.func @transform_9(%arg0: i32) -> (i32, i32) {
    %c0_i32 = arith.constant 0 : i32
    %c0_i32_0 = arith.constant 0 : i32
    return %c0_i32, %arg0 : i32, i32
  }
  func.func @transform_10(%arg0: i32) -> (i32, i32) {
    %c0_i32 = arith.constant 0 : i32
    %c0_i32_0 = arith.constant 0 : i32
    return %c0_i32, %arg0 : i32, i32
  }
  func.func @transform_11(%arg0: i32) -> (i32, i32, i32) {
    %c0_i32 = arith.constant 0 : i32
    %c0_i32_0 = arith.constant 0 : i32
    %c0_i32_1 = arith.constant 0 : i32
    %c0_i32_2 = arith.constant 0 : i32
    return %c0_i32, %c0_i32_0, %c0_i32_1 : i32, i32, i32
  }
  func.func @transform_12(%arg0: i32) -> (i32, i32, i32) {
    %c0_i32 = arith.constant 0 : i32
    %c0_i32_0 = arith.constant 0 : i32
    %c0_i32_1 = arith.constant 0 : i32
    %c0_i32_2 = arith.constant 0 : i32
    return %c0_i32, %c0_i32_0, %c0_i32_1 : i32, i32, i32
  }
}

</mosaic_0001>

<bundles_post_ra>
// kernel: decoder_rnn_forward.1
= control target key start
LH: loop header
LB: loop body
LE: loop exit
PB: predicated region body
PF: predicated region fallthrough
CT: control target
= control target key end

     0   :  { %s3446_s0 = inlined_call_operand.vmem [shape: s32[8,1], index: 0, kind: input, shape index: {}]   ;;  %s3447_s1 = inlined_call_operand.hbm [shape: bf16[256,128], index: 1, kind: input, shape index: {}]   ;;  %s3448_s2 = inlined_call_operand.vmem [shape: f32[2,8,128], index: 2, kind: input, shape index: {}]   ;;  %s3449_s3 = inlined_call_operand.vmem [shape: f32[2,8,128], index: 3, kind: input, shape index: {}]   ;;  %s3450_s4 = inlined_call_operand.hbm [shape: bf16[256,512], index: 4, kind: input, shape index: {}]   ;;  %s3451_s5 = inlined_call_operand.hbm [shape: f32[1,512], index: 5, kind: input, shape index: {}]   ;;  %s3452_s6 = inlined_call_operand.hbm [shape: bf16[256,512], index: 6, kind: input, shape index: {}]   ;;  %s3453_s7 = inlined_call_operand.hbm [shape: f32[1,512], index: 7, kind: input, shape index: {}]   ;;  %s3454_s8 = inlined_call_operand.hbm [shape: bf16[128,256], index: 8, kind: input, shape index: {}]   ;;  %s3455_s9 = inlined_call_operand.vmem [shape: f32[1,256], index: 9, kind: input, shape index: {}]   ;;  %s3456_s10 = inlined_call_operand.hbm [shape: f32[8,256], index: 10, kind: output, shape index: {0}]   ;;  %s3457_s11 = inlined_call_operand.hbm [shape: f32[2,8,128], index: 11, kind: output, shape index: {1}]   ;;  %s3458_s12 = inlined_call_operand.hbm [shape: f32[2,8,128], index: 12, kind: output, shape index: {2}]  }
   0x1   :  { %3468 = sst [smem:[#allocation26_spill]] %s3446_s0 }
   0x2   :  { %3469 = sst [smem:[#allocation27_spill]] %s3449_s3 }
   0x3   :  { %3470 = sst [smem:[#allocation28_spill]] %s3450_s4 }
   0x4   :  { %3471 = sst [smem:[#allocation29_spill]] %s3452_s6 }
   0x5   :  { %3472 = sst [smem:[#allocation30_spill]] %s3456_s10 }
   0x6   :  { %3473 = sst [smem:[#allocation31_spill]] %s3457_s11 }
   0x7   :  { %3474 = sst [smem:[#allocation32_spill]] %s3458_s12 }
   0x8   :  { %18 = vsyncpa [#allocation4], 0 }
   0x9   :  { %19 = vsyncpa [#allocation7], 0 }
   0xa   :  { %20 = vsyncpa [#allocation10], 0 }
   0xb   :  { %21 = vsyncpa [#allocation13], 0 }
   0xc   :  { %23 = vsyncpa [#allocation13 + $0x1], 0 }
   0xd   :  { %24 = vsyncpa [#allocation5], 0 }
   0xe   :  { %26 = vsyncpa [#allocation5 + $0x1], 0 }
   0xf   :  { %27 = vsyncpa [#allocation16], 0  ;;  %s3050_s21 = smov 0   ;;  %s3052_s22 = smov 0  }
  0x10   :  { %s3054_s23 = smov 0   ;;  %s3056_s24 = smov 0  }
  0x11 LB: > { %3475 = sst [smem:[#allocation24_spill]] %s2951_s21  ;;  %s3071_s25 = sadd.s32 4294967295, %s2963_s24   ;;  %s2963_s24 = sphi %s3056_s24, %s3517_s24   ;;  %s2959_s23 = sphi %s3054_s23, %s3516_s23   ;;  %s2955_s22 = sphi %s3052_s22, %s3515_s22   ;;  %s2951_s21 = sphi %s3050_s21, %s3514_s21  }
  0x12   : > { %s2043_s26 = sadd.s32 4294967294, %s2963_s24   ;;  %p221_p0 = scmp.ne.s32.totalorder %s2955_s22, %s2951_s21 }
  0x13   : > { %p3461_p1 = scmp.eq.s32.totalorder %s3071_s25, 0  ;;  %p277_p3 = scmp.eq.s32.totalorder %s2043_s26, 1 }
  0x14   : > { %p2044_p5 = scmp.ge.s32.totalorder %s2963_s24, 1  ;;  %p326_p7 = scmp.lt.s32.totalorder %s2963_s24, 3 }
  0x15   : > { %p3080_p4 = por %p3461_p1, %p221_p0  ;;  %p3085_p6 = por %p277_p3, %p221_p0 }
  0x16   : > { %p3091_p9 = pnand %p2044_p5, %p326_p7  ;;  %s2965_s30 = smov [#allocation6]  }
  0x17   : > { %s3476_s27 = scalar_select %p3080_p4, 1, 0 }
  0x18   : > { %s3477_s28 = scalar_select %p3085_p6, 1, 0 }
  0x19   : > { %s3479_s29 = scalar_select %p3091_p9, 1, 0 }
  0x1a   : > { %3478 = sst [smem:[#allocation25_spill]] %s3477_s28  ;;  %s360_s13 = sshll.u32 %s2965_s30, 4  ;;  %s3095_s13 = int_to_ptr.vmem [resolvable:$true] %s360_s13 }
  0x1b   : > { %p2320_p10 = pneg %p3091_p9  ;;  %s2966_s15 = smov [#allocation9]  }
  0x1c   : > { %s384_s16 = sshll.u32 %s2966_s15, 4  ;;  %s2967_s17 = smov [#allocation3]   ;;  %s3106_s16 = int_to_ptr.vmem [resolvable:$true] %s384_s16 }
  0x1d   : > { %p3102_p12 = pnand %p2320_p10, %p3461_p1  ;;  %s3108_s18 = sshll.u32 %s2967_s17, 4  ;;  %s342_s18 = int_to_ptr.vmem [resolvable:$true] %s3108_s18 }
  0x1e   : > { %s3481_s4 = sld [smem:[#allocation28_spill]] }
  0x1f   : > { %p3118_p0 = pneg %p3102_p12 }
  0x24   : > { %s2659_s26 = scalar_lea.hbm %s3481_s4, 8192 }
  0x25   : > { %p2660_p13 = scmp.ne.s32.totalorder %s3481_s4, %s2659_s26  ;;  %p2666_p7 = scmp.lt.u32.totalorder %s2659_s26, %s3481_s4 }
  0x27   : > { %p2662_p3 = pnand %p3118_p0, %p2660_p13 }
  0x29   : > { %p2663_p5 = pneg %p2662_p3 }
  0x2b   : > { %p2668_p10 = pnand %p2666_p7, %p2663_p5 }
  0x2d   : > { %2671 = shalt.err (!%p2668_p10)
}
  0x2e   : > { %s2672_s28 = scalar_lea.vmem %s3095_s13, 8192  ;;  %p2680_p2 = scmp.lt.s32.totalorder %s3095_s13, %s3095_s13 }
  0x2f   : > { %p2673_p11 = scmp.ne.s32.totalorder %s3095_s13, %s2672_s28  ;;  %p2681_p6 = scmp.lt.s32.totalorder %s2672_s28, %s2672_s28 }
  0x31   : > { %p2675_p8 = pnand %p2673_p11, %p3118_p0  ;;  %p2682_p13 = por %p2681_p6, %p2680_p2 }
  0x33   : > { %p2676_p1 = pneg %p2675_p8 }
  0x35   : > { %p2683_p3 = pnand %p2682_p13, %p2676_p1 }
  0x37   : > { %2686 = shalt.err (!%p2683_p3)
}
  0x38   : > { %s2968_s19 = smov 256   ;;  %s2969_s20 = smov 16  }
  0x39   : > { %2326 = dma.hbm_to_vmem [thread:$0]  (!%p3102_p12), %s3481_s4, 8192, %s3095_s13, [#allocation7], %s2968_s19, %s2968_s19, %s2969_s20  }
  0x3a   : > { %s3483_s6 = sld [smem:[#allocation29_spill]] }
  0x40   : > { %s2687_s10 = scalar_lea.hbm %s3483_s6, 8192 }
  0x41   : > { %p2688_p2 = scmp.ne.s32.totalorder %s3483_s6, %s2687_s10  ;;  %p2694_p8 = scmp.lt.u32.totalorder %s2687_s10, %s3483_s6 }
  0x43   : > { %p2690_p1 = pnand %p2688_p2, %p3118_p0 }
  0x45   : > { %p2691_p6 = pneg %p2690_p1 }
  0x47   : > { %p2696_p11 = pnand %p2694_p8, %p2691_p6 }
  0x49   : > { %2699 = shalt.err (!%p2696_p11)
}
  0x4a   : > { %s2700_s13 = scalar_lea.vmem %s3106_s16, 8192  ;;  %p2708_p13 = scmp.lt.s32.totalorder %s3106_s16, %s3106_s16 }
  0x4b   : > { %p2701_p5 = scmp.ne.s32.totalorder %s3106_s16, %s2700_s13  ;;  %p2709_p3 = scmp.lt.s32.totalorder %s2700_s13, %s2700_s13 }
  0x4d   : > { %p2703_p7 = pnand %p2701_p5, %p3118_p0  ;;  %p2710_p2 = por %p2709_p3, %p2708_p13 }
  0x4f   : > { %p2704_p10 = pneg %p2703_p7 }
  0x51   : > { %p2711_p1 = pnand %p2710_p2, %p2704_p10 }
  0x53   : > { %2714 = shalt.err (!%p2711_p1)
}
  0x54   : > { %2332 = dma.hbm_to_vmem [thread:$0]  (!%p3102_p12), %s3483_s6, 8192, %s3106_s16, [#allocation10], %s2968_s19, %s2968_s19, %s2969_s20  }
  0x55   : > { %s2715_s26 = scalar_lea.hbm %s3447_s1, 2048 }
  0x56   : > { %p2716_p6 = scmp.ne.s32.totalorder %s3447_s1, %s2715_s26  ;;  %p2722_p5 = scmp.lt.u32.totalorder %s2715_s26, %s3447_s1 }
  0x58   : > { %p2718_p8 = pnand %p2716_p6, %p3118_p0 }
  0x5a   : > { %p2719_p11 = pneg %p2718_p8 }
  0x5c   : > { %p2724_p7 = pnand %p2722_p5, %p2719_p11 }
  0x5e   : > { %2727 = shalt.err (!%p2724_p7)
}
  0x5f   : > { %s2728_s13 = scalar_lea.vmem %s342_s18, 2048  ;;  %p2736_p2 = scmp.lt.s32.totalorder %s342_s18, %s342_s18 }
  0x60   : > { %p2729_p10 = scmp.ne.s32.totalorder %s342_s18, %s2728_s13  ;;  %p2737_p1 = scmp.lt.s32.totalorder %s2728_s13, %s2728_s13 }
  0x62   : > { %p2731_p13 = pnand %p2729_p10, %p3118_p0  ;;  %p2738_p4 = por %p2737_p1, %p2736_p2 }
  0x64   : > { %p2732_p3 = pneg %p2731_p13 }
  0x66   : > { %p2739_p9 = pnand %p2738_p4, %p2732_p3 }
  0x68   : > { %2742 = shalt.err (!%p2739_p9)
}
  0x69   : > { %s2970_s16 = smov 64   ;;  %s2971_s19 = smov 4  }
  0x6a   : > { %2323 = dma.hbm_to_vmem [thread:$0]  (!%p3102_p12), %s3447_s1, 2048, %s342_s18, [#allocation4], %s2970_s16, %s2970_s16, %s2971_s19  }
  0x6b   : > { %s2972_s10 = smov [#allocation8]   ;;  %s2973_s12 = smov [#allocation11]  }
  0x6c   : > { %s374_s11 = sshll.u32 %s2972_s10, 4  ;;  %s398_s26 = sshll.u32 %s2973_s12, 4  ;;  %s375_s11 = int_to_ptr.vmem [resolvable:$true] %s374_s11  ;;  %s399_s26 = int_to_ptr.vmem [resolvable:$true] %s398_s26 }
  0x6d   : > { %s2743_s17 = scalar_lea.hbm %s3451_s5, 64 }
  0x6e   : > { %p2744_p4 = scmp.ne.s32.totalorder %s3451_s5, %s2743_s17  ;;  %p2750_p8 = scmp.lt.u32.totalorder %s2743_s17, %s3451_s5 }
  0x70   : > { %p2746_p9 = pnand %p2744_p4, %p3118_p0 }
  0x72   : > { %p2747_p6 = pneg %p2746_p9 }
  0x74   : > { %p2752_p11 = pnand %p2750_p8, %p2747_p6 }
  0x76   : > { %2755 = shalt.err (!%p2752_p11)
}
  0x77   : > { %s2756_s18 = scalar_lea.vmem %s375_s11, 64  ;;  %p2764_p13 = scmp.lt.s32.totalorder %s375_s11, %s375_s11 }
  0x78   : > { %p2757_p5 = scmp.ne.s32.totalorder %s375_s11, %s2756_s18  ;;  %p2765_p3 = scmp.lt.s32.totalorder %s2756_s18, %s2756_s18 }
  0x7a   : > { %p2759_p7 = pnand %p2757_p5, %p3118_p0  ;;  %p2766_p2 = por %p2765_p3, %p2764_p13 }
  0x7c   : > { %p2760_p10 = pneg %p2759_p7 }
  0x7e   : > { %p2767_p1 = pnand %p2766_p2, %p2760_p10 }
  0x80   : > { %2770 = shalt.err (!%p2767_p1)
}
  0x81   : > { %2329 = dma.hbm_to_vmem [thread:$0]  (!%p3102_p12), %s3451_s5, 64, %s375_s11, [#allocation7]  }
  0x82   : > { %s2771_s10 = scalar_lea.hbm %s3453_s7, 64 }
  0x83   : > { %p2772_p4 = scmp.ne.s32.totalorder %s3453_s7, %s2771_s10  ;;  %p2778_p8 = scmp.lt.u32.totalorder %s2771_s10, %s3453_s7 }
  0x85   : > { %p2774_p9 = pnand %p2772_p4, %p3118_p0 }
  0x87   : > { %p2775_p6 = pneg %p2774_p9 }
  0x89   : > { %p2780_p11 = pnand %p2778_p8, %p2775_p6 }
  0x8b   : > { %2783 = shalt.err (!%p2780_p11)
}
  0x8c   : > { %s2784_s28 = scalar_lea.vmem %s399_s26, 64  ;;  %p2792_p13 = scmp.lt.s32.totalorder %s399_s26, %s399_s26 }
  0x8d   : > { %p2785_p5 = scmp.ne.s32.totalorder %s399_s26, %s2784_s28  ;;  %p2793_p3 = scmp.lt.s32.totalorder %s2784_s28, %s2784_s28 }
  0x8f   : > { %p2787_p7 = pnand %p2785_p5, %p3118_p0  ;;  %p2794_p2 = por %p2793_p3, %p2792_p13 }
  0x91   : > { %p2788_p10 = pneg %p2787_p7 }
  0x93   : > { %p2795_p1 = pnand %p2794_p2, %p2788_p10 }
  0x95   : > { %2798 = shalt.err (!%p2795_p1)
}
  0x96   : > { %2335 = dma.hbm_to_vmem [thread:$0]  (!%p3102_p12), %s3453_s7, 64, %s399_s26, [#allocation10]  }
  0x97   : > { %s3221_s21 = sadd.s32 1, %s2963_s24   ;;  %s208_s14 = sadd.s32 1, %s2959_s23 }
  0x98   : > { %s205_s18 = ssub.s32 %s2963_s24, %s3221_s21  ;;  %p215_p4 = scmp.ne.s32.totalorder %s2959_s23, %s2955_s22 }
  0x99   : > { %p206_p0 = scmp.eq.s32.totalorder %s205_s18, 0  ;;  %p216_p9 = scmp.eq.s32.totalorder %s2963_s24, 0 }
  0x9a   : > { %p2349_p6 = scmp.lt.s32.totalorder %s2963_s24, 2  ;;  %p3484_p11 = scmp.eq.s32.totalorder %s3071_s25, 1 }
  0x9b   : > { %s3231_s20 = scalar_select %p206_p0, %s2959_s23, %s208_s14  }
  0x9c   : > { %p217_p8 = por %p216_p9, %p215_p4  ;;  %p3235_p5 = por %p3484_p11, %p215_p4 }
  0x9d   : > { %s409_s4 = sand.u32 1, %s2959_s23   ;;  %s2052_s6 = sshll.u32 %s2963_s24, 6 }
  0x9e   : > { %s2051_s26 = sshll.u32 %s409_s4, 6  ;;  %s3244_s30 = scalar_lea.hbm %s3454_s8, %s2052_s6 }
  0x9f   : > { %s413_s15 = scalar_lea.vmem [#allocation12], %s2051_s26  ;;  %p3246_p12 = pnand %p2349_p6, %p217_p8 }
  0xa0   : > { %s419_s17 = sshll.u32 %s413_s15, 4  ;;  %s3252_s11 = scalar_lea.sflag [#allocation13], %s409_s4  ;;  %s3250_s17 = int_to_ptr.vmem [resolvable:$true] %s419_s17 }
  0xa1   : > { %s2799_s13 = scalar_lea.hbm %s3244_s30, 1024  ;;  %p2801_p10 = pneg %p3246_p12 }
  0xa2   : > { %p2800_p7 = scmp.ne.s32.totalorder %s3244_s30, %s2799_s13  ;;  %s2804_s6 = scalar_lea.hbm %s3454_s8, 2048 }
  0xa3   : > { %p2805_p2 = scmp.lt.u32.totalorder %s3244_s30, %s3454_s8  ;;  %p2806_p1 = scmp.lt.u32.totalorder %s2804_s6, %s2799_s13 }
  0xa4   : > { %p2802_p13 = pnand %p2801_p10, %p2800_p7  ;;  %p2808_p4 = scmp.lt.u32.totalorder %s2799_s13, %s3244_s30 }
  0xa5   : > { %p2807_p0 = por %p2806_p1, %p2805_p2 }
  0xa6   : > { %p2803_p3 = pneg %p2802_p13 }
  0xa7   : > { %p2809_p9 = por %p2808_p4, %p2807_p0 }
  0xa9   : > { %p2810_p6 = pnand %p2809_p9, %p2803_p3 }
  0xab   : > { %2813 = shalt.err (!%p2810_p6)
}
  0xac   : > { %s2814_s4 = scalar_lea.vmem %s3250_s17, 1024  ;;  %s2974_s12 = smov [#allocation12]  }
  0xad   : > { %p2815_p8 = scmp.ne.s32.totalorder %s3250_s17, %s2814_s4  ;;  %s2819_s15 = sshll.u32 %s2974_s12, 4  ;;  %s2820_s15 = int_to_ptr.vmem [resolvable:$false] %s2819_s15 }
  0xae   : > { %s2821_s18 = scalar_lea.vmem %s2820_s15, 2048  ;;  %p2822_p13 = scmp.lt.s32.totalorder %s3250_s17, %s2820_s15 }
  0xaf   : > { %p2817_p11 = pnand %p2815_p8, %p2801_p10  ;;  %p2823_p2 = scmp.lt.s32.totalorder %s2821_s18, %s2814_s4 }
  0xb1   : > { %p2818_p7 = pneg %p2817_p11  ;;  %p2824_p1 = por %p2823_p2, %p2822_p13 }
  0xb3   : > { %p2825_p0 = pnand %p2824_p1, %p2818_p7 }
  0xb5   : > { %2828 = shalt.err (!%p2825_p0)
}
  0xb6   : > { %s2975_s13 = smov 128   ;;  %p3487_p10 = scmp.ne.s32.totalorder %s3479_s29, 0 }
  0xb7   : > { %2339 = dma.hbm_to_vmem [thread:$0]  (!%p3246_p12), %s3244_s30, 1024, %s3250_s17, %s3252_s11, %s2975_s13, %s2970_s16, %s2971_s19  }
  0xb8   : > { %437 = sbr.rel (%p3487_p10) target bundleno = 1346 (0x542), region = 60  ;;  %p3488_p3 = scmp.eq.s32.totalorder (!%p3487_p10), %s3071_s25, 0 }
  0xbf   : > { %2926 = dma.done.wait (%p3488_p3), [#allocation4], 2048   ;;  %p3489_p4 = pmov %p3488_p3 }
  0xc0   : > { %p3490_p9 = pmov %p3488_p3 }
  0xc1   : > { %2928 = vsyncadd (%p3489_p4), [#allocation4], 4294965248 }
  0xc2   : > { %2930 = dma.done.wait (%p3490_p9), [#allocation7], 8256   ;;  %p3491_p6 = pmov %p3488_p3 }
  0xc3   : > { %p3492_p8 = pmov %p3488_p3 }
  0xc4   : > { %2932 = vsyncadd (%p3491_p6), [#allocation7], 4294959040 }
  0xc5   : > { %2934 = dma.done.wait (%p3492_p8), [#allocation10], 8256   ;;  %p3493_p12 = pmov %p3488_p3 }
  0xc6   : > { %s3297_s29 = sand.u32 1, %s2955_s22   ;;  %p3494_p11 = scmp.ne.s32.totalorder %s3476_s27, 0 }
  0xc7   : > { %2936 = vsyncadd (%p3493_p12), [#allocation10], 4294959040  ;;  %s2059_s16 = sshll.u32 %s3297_s29, 6  ;;  %s460_s19 = scalar_lea.sflag [#allocation13], %s3297_s29 }
  0xc8   : > { %s3301_s30 = scalar_lea.vmem [#allocation12], %s2059_s16 }
  0xc9   : > { %2938 = dma.done.wait (%p3494_p11), %s460_s19, 1024  }
  0xca   : > { %2940 = vsyncadd (%p3494_p11), %s460_s19, 4294966272  ;;  %s2060_s17 = sshll.u32 %s3297_s29, 3  ;;  %p507_p7 = scmp.lt.s32.totalorder %s3071_s25, 1 }
  0xcb   : > { %s3316_s26 = scalar_lea.vmem [#allocation14], %s2060_s17  ;;  %p3495_p13 = scmp.ne.s32.totalorder %s3071_s25, 0 }
  0xcc   : > { %s3310_s28 = scalar_select %p507_p7, %s3071_s25, 1 }
  0xcd   : > { %514 = sbr.rel (%p3495_p13) target bundleno = 1080 (0x438), region = 88  ;;  %s3496_s0 = sld [smem:[#allocation26_spill]] (!%p3495_p13)  ;;  %v2976_v1 = vmov (!%p3495_p13), 0   ;;  %v2411_v2 = vld [vmem:[#allocation3 + $0x40] sm:$0xff] (!%p3495_p13)   ;;  %v2413_v4 = vld [vmem:[#allocation3 + $0x48] sm:$0xff] (!%p3495_p13)   ;;  %v2415_v6 = vld [vmem:[#allocation3 + $0x50] sm:$0xff] (!%p3495_p13)   ;;  %v516_v49 = vlaneseq (!%p3495_p13) }
  0xce   : > { %2410 = vset.pattern.permute.xlu0 (!%p3495_p13), %v2976_v1  ;;  %v2412_v3 = vld [vmem:[#allocation3] sm:$0xff] (!%p3495_p13)   ;;  %2237 = vmatprep.subr.bf16.mxu0 (!%p3495_p13), %v2411_v2  ;;  %v2414_v5 = vld [vmem:[#allocation3 + $0x8] sm:$0xff] (!%p3495_p13)   ;;  %v2416_v7 = vld [vmem:[#allocation3 + $0x10] sm:$0xff] (!%p3495_p13)   ;;  %v2977_v55 = vmov (!%p3495_p13), 1.0|1.0   ;;  %s3497_s19 = sld [smem:[#allocation27_spill]] (!%p3495_p13) }
  0xcf   : > { %2238 = vmatpush3.bf16.msra.mxu0 (!%p3495_p13), %v2412_v3  ;;  %v2417_v8 = vld [vmem:[#allocation3 + $0x58] sm:$0xff] (!%p3495_p13)   ;;  %v2419_v10 = vld [vmem:[#allocation3 + $0x60] sm:$0xff] (!%p3495_p13)   ;;  %v2421_v12 = vld [vmem:[#allocation3 + $0x68] sm:$0xff] (!%p3495_p13)   ;;  %v517_v50 = vand.u32 (!%p3495_p13), 127, %v516_v49 }
  0xd0   : > { %2239 = vmatprep.subr.bf16.mxu0 (!%p3495_p13), %v2413_v4  ;;  %v2418_v9 = vld [vmem:[#allocation3 + $0x18] sm:$0xff] (!%p3495_p13)   ;;  %v2420_v11 = vld [vmem:[#allocation3 + $0x20] sm:$0xff] (!%p3495_p13)   ;;  %v2422_v16 = vld [vmem:[#allocation3 + $0x28] sm:$0xff] (!%p3495_p13)  }
  0xd1   : > { %v2427_v13 = vld [vmem:[#allocation6 + $0x4] ss:$16 sps:$4 sm:$0xff] (!%p3495_p13)   ;;  %v2432_v14 = vld [vmem:[#allocation6] ss:$16 sps:$4 sm:$0xff] (!%p3495_p13)   ;;  %v2425_v21 = vld [vmem:[#allocation3 + $0x78] sm:$0xff] (!%p3495_p13)   ;;  %v518_v51 = vadd.s32 (!%p3495_p13), 128, %v517_v50 }
  0xd2   : > { %1108 = vmatprep.subr.bf16.mxu1 (!%p3495_p13), %v2427_v13  ;;  %v2433_v15 = vld [vmem:[#allocation6 + $0x24] ss:$16 sps:$4 sm:$0xff] (!%p3495_p13)   ;;  %v2438_v18 = vld [vmem:[#allocation6 + $0x20] ss:$16 sps:$4 sm:$0xff] (!%p3495_p13)   ;;  %v2426_v24 = vld [vmem:[#allocation3 + $0x38] sm:$0xff] (!%p3495_p13)  }
  0xd3   : > { %v515_v0 = vld [vmem:[%s3496_s0] sm:$0xff] (!%p3495_p13)  ;;  %2240 = vmatpush3.bf16.msra.mxu0 (!%p3495_p13), %v2414_v5  ;;  %1109 = vmatpush1.bf16.msra.mxu1 (!%p3495_p13), %v2432_v14  ;;  %v2423_v17 = vld [vmem:[#allocation3 + $0x70] sm:$0xff] (!%p3495_p13)  }
  0xd4   : > { %520 = vperm.xlu0 %2410, %v515_v0   ;;  %2241 = vmatprep.subr.bf16.mxu0 %v2415_v6  ;;  %v2439_v19 = vld [vmem:[#allocation6 + $0x44] ss:$16 sps:$4 sm:$0xff]   ;;  %v2444_v22 = vld [vmem:[#allocation6 + $0x40] ss:$16 sps:$4 sm:$0xff]   ;;  %v2431_v26 = vld [vmem:[#allocation6 + $0xc] ss:$16 sps:$4 sm:$0xff]  }
  0xd5   : > { %1110 = vmatprep.subr.bf16.mxu1 %v2433_v15  ;;  %v2424_v20 = vld [vmem:[#allocation3 + $0x30] sm:$0xff]   ;;  %v2429_v53 = vld [vmem:[#allocation6 + $0x8] ss:$16 sps:$4 sm:$0xff]   ;;  %v2437_v54 = vld [vmem:[#allocation6 + $0x2c] ss:$16 sps:$4 sm:$0xff]  }
  0xd6   : > { %v2445_v23 = vld [vmem:[#allocation6 + $0x64] ss:$16 sps:$4 sm:$0xff]   ;;  %v2450_v25 = vld [vmem:[#allocation6 + $0x60] ss:$16 sps:$4 sm:$0xff]   ;;  %v2435_v56 = vld [vmem:[#allocation6 + $0x28] ss:$16 sps:$4 sm:$0xff]  }
  0xd7   : > { %2242 = vmatpush3.bf16.msra.mxu0 %v2416_v7  ;;  %1111 = vmatpush1.bf16.msra.mxu1 %v2438_v18  ;;  %v2451_v27 = vld [vmem:[#allocation6 + $0x84] ss:$16 sps:$4 sm:$0xff]   ;;  %v2456_v28 = vld [vmem:[#allocation6 + $0x80] ss:$16 sps:$4 sm:$0xff]   ;;  %v2443_v57 = vld [vmem:[#allocation6 + $0x4c] ss:$16 sps:$4 sm:$0xff]  }
  0xd8   : > { %2243 = vmatprep.subr.bf16.mxu0 %v2417_v8  ;;  %1112 = vmatprep.subr.bf16.mxu1 %v2439_v19  ;;  %v2457_v29 = vld [vmem:[#allocation6 + $0xa4] ss:$16 sps:$4 sm:$0xff]   ;;  %v2462_v30 = vld [vmem:[#allocation6 + $0xa0] ss:$16 sps:$4 sm:$0xff]   ;;  %v2441_v58 = vld [vmem:[#allocation6 + $0x48] ss:$16 sps:$4 sm:$0xff]  }
  0xd9   : > { %v2463_v31 = vld [vmem:[#allocation6 + $0xc4] ss:$16 sps:$4 sm:$0xff]   ;;  %v2468_v32 = vld [vmem:[#allocation6 + $0xc0] ss:$16 sps:$4 sm:$0xff]   ;;  %v2449_v59 = vld [vmem:[#allocation6 + $0x6c] ss:$16 sps:$4 sm:$0xff]  }
  0xda   : > { %v2469_v33 = vld [vmem:[#allocation6 + $0xe4] ss:$16 sps:$4 sm:$0xff]   ;;  %v2474_v34 = vld [vmem:[#allocation6 + $0xe0] ss:$16 sps:$4 sm:$0xff]   ;;  %v2447_v60 = vld [vmem:[#allocation6 + $0x68] ss:$16 sps:$4 sm:$0xff]  }
  0xdb   : > { %2244 = vmatpush3.bf16.msra.mxu0 %v2418_v9  ;;  %1113 = vmatpush1.bf16.msra.mxu1 %v2444_v22  ;;  %v2475_v35 = vld [vmem:[#allocation6 + $0x104] ss:$16 sps:$4 sm:$0xff]   ;;  %v2480_v36 = vld [vmem:[#allocation6 + $0x100] ss:$16 sps:$4 sm:$0xff]   ;;  %v2455_v61 = vld [vmem:[#allocation6 + $0x8c] ss:$16 sps:$4 sm:$0xff]  }
  0xdc   : > { %2245 = vmatprep.subr.bf16.mxu0 %v2419_v10  ;;  %1114 = vmatprep.subr.bf16.mxu1 %v2445_v23  ;;  %v2481_v37 = vld [vmem:[#allocation6 + $0x124] ss:$16 sps:$4 sm:$0xff]   ;;  %v2486_v38 = vld [vmem:[#allocation6 + $0x120] ss:$16 sps:$4 sm:$0xff]   ;;  %v2453_v62 = vld [vmem:[#allocation6 + $0x88] ss:$16 sps:$4 sm:$0xff]  }
  0xdd   : > { %v2487_v39 = vld [vmem:[#allocation6 + $0x144] ss:$16 sps:$4 sm:$0xff]   ;;  %v2492_v40 = vld [vmem:[#allocation6 + $0x140] ss:$16 sps:$4 sm:$0xff]   ;;  %v2461_v63 = vld [vmem:[#allocation6 + $0xac] ss:$16 sps:$4 sm:$0xff]  }
  0xde   : > { %v2493_v41 = vld [vmem:[#allocation6 + $0x164] ss:$16 sps:$4 sm:$0xff]   ;;  %v2498_v42 = vld [vmem:[#allocation6 + $0x160] ss:$16 sps:$4 sm:$0xff]   ;;  %v2459_v0 = vld [vmem:[#allocation6 + $0xa8] ss:$16 sps:$4 sm:$0xff]  }
  0xdf   : > { %2246 = vmatpush3.bf16.msra.mxu0 %v2420_v11  ;;  %1115 = vmatpush1.bf16.msra.mxu1 %v2450_v25  ;;  %v2499_v43 = vld [vmem:[#allocation6 + $0x184] ss:$16 sps:$4 sm:$0xff]   ;;  %v2504_v44 = vld [vmem:[#allocation6 + $0x180] ss:$16 sps:$4 sm:$0xff]   ;;  %v2467_v1 = vld [vmem:[#allocation6 + $0xcc] ss:$16 sps:$4 sm:$0xff]  }
  0xe0   : > { %2247 = vmatprep.subr.bf16.mxu0 %v2421_v12  ;;  %1116 = vmatprep.subr.bf16.mxu1 %v2451_v27  ;;  %v2505_v45 = vld [vmem:[#allocation6 + $0x1a4] ss:$16 sps:$4 sm:$0xff]   ;;  %v2510_v46 = vld [vmem:[#allocation6 + $0x1a0] ss:$16 sps:$4 sm:$0xff]   ;;  %v2465_v2 = vld [vmem:[#allocation6 + $0xc8] ss:$16 sps:$4 sm:$0xff]  }
  0xe1   : > { %v2511_v47 = vld [vmem:[#allocation6 + $0x1c4] ss:$16 sps:$4 sm:$0xff]   ;;  %v2516_v48 = vld [vmem:[#allocation6 + $0x1c0] ss:$16 sps:$4 sm:$0xff]   ;;  %v2473_v3 = vld [vmem:[#allocation6 + $0xec] ss:$16 sps:$4 sm:$0xff]  }
  0xe2   : > { %v2471_v4 = vld [vmem:[#allocation6 + $0xe8] ss:$16 sps:$4 sm:$0xff]   ;;  %v2479_v5 = vld [vmem:[#allocation6 + $0x10c] ss:$16 sps:$4 sm:$0xff]   ;;  %v2517_v19 = vld [vmem:[#allocation6 + $0x1e4] ss:$16 sps:$4 sm:$0xff]  }
  0xe3   : > { %2248 = vmatpush3.bf16.msra.mxu0 %v2422_v16  ;;  %1117 = vmatpush1.bf16.msra.mxu1 %v2456_v28  ;;  %v2477_v6 = vld [vmem:[#allocation6 + $0x108] ss:$16 sps:$4 sm:$0xff]   ;;  %v2485_v7 = vld [vmem:[#allocation6 + $0x12c] ss:$16 sps:$4 sm:$0xff]   ;;  %v2522_v22 = vld [vmem:[#allocation6 + $0x1e0] ss:$16 sps:$4 sm:$0xff]  }
  0xe4   : > { %2249 = vmatprep.subr.bf16.mxu0 %v2423_v17  ;;  %1118 = vmatprep.subr.bf16.mxu1 %v2457_v29  ;;  %v2483_v8 = vld [vmem:[#allocation6 + $0x128] ss:$16 sps:$4 sm:$0xff]   ;;  %v2491_v9 = vld [vmem:[#allocation6 + $0x14c] ss:$16 sps:$4 sm:$0xff]  }
  0xe5   : > { %v2489_v10 = vld [vmem:[#allocation6 + $0x148] ss:$16 sps:$4 sm:$0xff]   ;;  %v2497_v11 = vld [vmem:[#allocation6 + $0x16c] ss:$16 sps:$4 sm:$0xff]  }
  0xe6   : > { %v2495_v12 = vld [vmem:[#allocation6 + $0x168] ss:$16 sps:$4 sm:$0xff]   ;;  %v2503_v13 = vld [vmem:[#allocation6 + $0x18c] ss:$16 sps:$4 sm:$0xff]  }
  0xe7   : > { %2250 = vmatpush3.bf16.msra.mxu0 %v2424_v20  ;;  %1119 = vmatpush1.bf16.msra.mxu1 %v2462_v30  ;;  %v2501_v14 = vld [vmem:[#allocation6 + $0x188] ss:$16 sps:$4 sm:$0xff]   ;;  %v2509_v15 = vld [vmem:[#allocation6 + $0x1ac] ss:$16 sps:$4 sm:$0xff]  }
  0xe8   : > { %2251 = vmatprep.subr.bf16.mxu0 %v2425_v21  ;;  %1120 = vmatprep.subr.bf16.mxu1 %v2463_v31  ;;  %v2507_v16 = vld [vmem:[#allocation6 + $0x1a8] ss:$16 sps:$4 sm:$0xff]   ;;  %v2515_v17 = vld [vmem:[#allocation6 + $0x1cc] ss:$16 sps:$4 sm:$0xff]  }
  0xe9   : > { %v2513_v18 = vld [vmem:[#allocation6 + $0x1c8] ss:$16 sps:$4 sm:$0xff]   ;;  %v2521_v20 = vld [vmem:[#allocation6 + $0x1ec] ss:$16 sps:$4 sm:$0xff]  }
  0xea   : > { %v2519_v21 = vld [vmem:[#allocation6 + $0x1e8] ss:$16 sps:$4 sm:$0xff]  }
  0xeb   : > { %2252 = vmatpush3.bf16.msra.mxu0 %v2426_v24  ;;  %1121 = vmatpush1.bf16.msra.mxu1 %v2468_v32  ;;  %v698_v23 = vld [vmem:[%s3448_s2] sm:$0xff]  ;;  %v2523_v32 = vld [vmem:[#allocation9] ss:$16 sps:$4 sm:$0xff]  }
  0xec   : > { %1149 = vmatprep.subr.bf16.mxu0 %v2431_v26  ;;  %1122 = vmatprep.subr.bf16.mxu1 %v2469_v33  ;;  %v701_v24 = vpack.c.bf16 %v698_v23, %v698_v23  ;;  %v2525_v25 = vld [vmem:[#allocation9 + $0x4] ss:$16 sps:$4 sm:$0xff]   ;;  %v2528_v26 = vld [vmem:[#allocation9 + $0xc] ss:$16 sps:$4 sm:$0xff]   ;;  %v2526_v33 = vld [vmem:[#allocation9 + $0x8] ss:$16 sps:$4 sm:$0xff]  }
  0xed   : > { %v2606_v23 = vld [vmem:[#allocation9 + $0x1ac] ss:$16 sps:$4 sm:$0xff]  }
  0xee   : > { %1140 = vmatprep.mubr.bf16.mxu1 %v701_v24 }
  0xef   : > { %1123 = vmatpush1.bf16.msra.mxu1 %v2474_v34 }
  0xf0   : > { %1124 = vmatprep.subr.bf16.mxu1 %v2475_v35  ;;  %v2531_v35 = vld [vmem:[#allocation9 + $0x24] ss:$16 sps:$4 sm:$0xff]  }
  0xf3   : > { %1125 = vmatpush1.bf16.msra.mxu1 %v2480_v36  ;;  %v2534_v36 = vld [vmem:[#allocation9 + $0x2c] ss:$16 sps:$4 sm:$0xff]  }
  0xf4   : > { %1126 = vmatprep.subr.bf16.mxu1 %v2481_v37  ;;  %v2529_v37 = vld [vmem:[#allocation9 + $0x20] ss:$16 sps:$4 sm:$0xff]  }
  0xf7   : > { %1127 = vmatpush1.bf16.msra.mxu1 %v2486_v38  ;;  %v2532_v38 = vld [vmem:[#allocation9 + $0x28] ss:$16 sps:$4 sm:$0xff]  }
  0xf8   : > { %1128 = vmatprep.subr.bf16.mxu1 %v2487_v39  ;;  %v2537_v39 = vld [vmem:[#allocation9 + $0x44] ss:$16 sps:$4 sm:$0xff]  }
  0xfb   : > { %1129 = vmatpush1.bf16.msra.mxu1 %v2492_v40  ;;  %v2540_v40 = vld [vmem:[#allocation9 + $0x4c] ss:$16 sps:$4 sm:$0xff]  }
  0xfc   : > { %1130 = vmatprep.subr.bf16.mxu1 %v2493_v41  ;;  %v2535_v41 = vld [vmem:[#allocation9 + $0x40] ss:$16 sps:$4 sm:$0xff]  }
  0xff   : > { %1131 = vmatpush1.bf16.msra.mxu1 %v2498_v42  ;;  %v2538_v42 = vld [vmem:[#allocation9 + $0x48] ss:$16 sps:$4 sm:$0xff]  }
 0x100   : > { %1132 = vmatprep.subr.bf16.mxu1 %v2499_v43  ;;  %v2543_v43 = vld [vmem:[#allocation9 + $0x64] ss:$16 sps:$4 sm:$0xff]  }
 0x103   : > { %1133 = vmatpush1.bf16.msra.mxu1 %v2504_v44  ;;  %v2546_v44 = vld [vmem:[#allocation9 + $0x6c] ss:$16 sps:$4 sm:$0xff]  }
 0x104   : > { %1134 = vmatprep.subr.bf16.mxu1 %v2505_v45  ;;  %v2541_v45 = vld [vmem:[#allocation9 + $0x60] ss:$16 sps:$4 sm:$0xff]  }
 0x107   : > { %1135 = vmatpush1.bf16.msra.mxu1 %v2510_v46  ;;  %v2544_v46 = vld [vmem:[#allocation9 + $0x68] ss:$16 sps:$4 sm:$0xff]  }
 0x108   : > { %1136 = vmatprep.subr.bf16.mxu1 %v2511_v47  ;;  %v2549_v47 = vld [vmem:[#allocation9 + $0x84] ss:$16 sps:$4 sm:$0xff]  }
 0x10b   : > { %1137 = vmatpush1.bf16.msra.mxu1 %v2516_v48  ;;  %v2552_v48 = vld [vmem:[#allocation9 + $0x8c] ss:$16 sps:$4 sm:$0xff]  }
 0x10c   : > { %1138 = vmatprep.subr.bf16.mxu1 %v2517_v19  ;;  %v2598_v19 = vld [vmem:[#allocation9 + $0x188] ss:$16 sps:$4 sm:$0xff]  }
 0x10f   : > { %1139 = vmatpush1.bf16.msra.mxu1 %v2522_v22  ;;  %v2604_v22 = vld [vmem:[#allocation9 + $0x1a8] ss:$16 sps:$4 sm:$0xff]  }
 0x110   : > { %1628 = vmatprep.subr.bf16.mxu1 %v2525_v25  ;;  %v2612_v25 = vld [vmem:[#allocation9 + $0x1cc] ss:$16 sps:$4 sm:$0xff]  }
 0x153   : > { %v521_v52 = vpop.permute.xlu0 %520 }
 0x154   : > { %vm522_vm0 = vcmp.eq.s32.totalorder %v517_v50, %v521_v52  ;;  %vm523_vm1 = vcmp.eq.s32.totalorder %v518_v51, %v521_v52  ;;  %v2547_v50 = vld [vmem:[#allocation9 + $0x80] ss:$16 sps:$4 sm:$0xff]   ;;  %v2550_v51 = vld [vmem:[#allocation9 + $0x88] ss:$16 sps:$4 sm:$0xff]   ;;  %v2555_v52 = vld [vmem:[#allocation9 + $0xa4] ss:$16 sps:$4 sm:$0xff]  }
 0x155   : > { %vm2082_vm2 = vmpackc.low %vm522_vm0, %vm522_vm0 }
 0x156   : > { %vm2080_vm3 = vmpackc.low %vm523_vm1, %vm523_vm1 }
 0x157   : > { %2081 = vmatprep.mubr.msk.bf16.mxu0 %vm2080_vm3, %v2977_v55 }
 0x158   : > { %2083 = vmatmul.mubr.msk.bf16.vlgmr.msra.gmra.mrb[0].mxu0 %vm2082_vm2, %v2977_v55  ;;  %v2556_v55 = vld [vmem:[#allocation9 + $0xa8] ss:$16 sps:$4 sm:$0xff]  }
 0x159   : > { %1150 = vmatpush1.bf16.msra.mxu0 %v2429_v53  ;;  %1181 = vmatprep.mubr.bf16.mxu0 %v701_v24  ;;  %v2558_v53 = vld [vmem:[#allocation9 + $0xac] ss:$16 sps:$4 sm:$0xff]   ;;  %v2609_v24 = vld [vmem:[#allocation9 + $0x1c4] ss:$16 sps:$4 sm:$0xff]  }
 0x15a   : > { %1151 = vmatprep.subr.bf16.mxu0 %v2437_v54  ;;  %v2553_v54 = vld [vmem:[#allocation9 + $0xa0] ss:$16 sps:$4 sm:$0xff]  }
 0x15d   : > { %1152 = vmatpush1.bf16.msra.mxu0 %v2435_v56  ;;  %v2561_v56 = vld [vmem:[#allocation9 + $0xc4] ss:$16 sps:$4 sm:$0xff]  }
 0x15e   : > { %1153 = vmatprep.subr.bf16.mxu0 %v2443_v57  ;;  %v2564_v57 = vld [vmem:[#allocation9 + $0xcc] ss:$16 sps:$4 sm:$0xff]  }
 0x161   : > { %1154 = vmatpush1.bf16.msra.mxu0 %v2441_v58  ;;  %v2559_v58 = vld [vmem:[#allocation9 + $0xc0] ss:$16 sps:$4 sm:$0xff]  }
 0x162   : > { %1155 = vmatprep.subr.bf16.mxu0 %v2449_v59  ;;  %v2562_v59 = vld [vmem:[#allocation9 + $0xc8] ss:$16 sps:$4 sm:$0xff]  }
 0x165   : > { %1156 = vmatpush1.bf16.msra.mxu0 %v2447_v60  ;;  %v2567_v60 = vld [vmem:[#allocation9 + $0xe4] ss:$16 sps:$4 sm:$0xff]  }
 0x166   : > { %1157 = vmatprep.subr.bf16.mxu0 %v2455_v61  ;;  %v2570_v61 = vld [vmem:[#allocation9 + $0xec] ss:$16 sps:$4 sm:$0xff]  }
 0x169   : > { %1158 = vmatpush1.bf16.msra.mxu0 %v2453_v62  ;;  %v2565_v62 = vld [vmem:[#allocation9 + $0xe0] ss:$16 sps:$4 sm:$0xff]  }
 0x16a   : > { %1159 = vmatprep.subr.bf16.mxu0 %v2461_v63  ;;  %v2568_v63 = vld [vmem:[#allocation9 + $0xe8] ss:$16 sps:$4 sm:$0xff]  }
 0x16d   : > { %1160 = vmatpush1.bf16.msra.mxu0 %v2459_v0  ;;  %v2573_v0 = vld [vmem:[#allocation9 + $0x104] ss:$16 sps:$4 sm:$0xff]  }
 0x16e   : > { %1161 = vmatprep.subr.bf16.mxu0 %v2467_v1  ;;  %v2576_v1 = vld [vmem:[#allocation9 + $0x10c] ss:$16 sps:$4 sm:$0xff]  }
 0x171   : > { %1162 = vmatpush1.bf16.msra.mxu0 %v2465_v2  ;;  %v2571_v2 = vld [vmem:[#allocation9 + $0x100] ss:$16 sps:$4 sm:$0xff]  }
 0x172   : > { %1163 = vmatprep.subr.bf16.mxu0 %v2473_v3  ;;  %v2574_v3 = vld [vmem:[#allocation9 + $0x108] ss:$16 sps:$4 sm:$0xff]  }
 0x175   : > { %1164 = vmatpush1.bf16.msra.mxu0 %v2471_v4  ;;  %v2579_v4 = vld [vmem:[#allocation9 + $0x124] ss:$16 sps:$4 sm:$0xff]  }
 0x176   : > { %1165 = vmatprep.subr.bf16.mxu0 %v2479_v5  ;;  %v2582_v5 = vld [vmem:[#allocation9 + $0x12c] ss:$16 sps:$4 sm:$0xff]  }
 0x179   : > { %1166 = vmatpush1.bf16.msra.mxu0 %v2477_v6  ;;  %v2577_v6 = vld [vmem:[#allocation9 + $0x120] ss:$16 sps:$4 sm:$0xff]  }
 0x17a   : > { %1167 = vmatprep.subr.bf16.mxu0 %v2485_v7  ;;  %v2580_v7 = vld [vmem:[#allocation9 + $0x128] ss:$16 sps:$4 sm:$0xff]  }
 0x17d   : > { %1168 = vmatpush1.bf16.msra.mxu0 %v2483_v8  ;;  %v2585_v8 = vld [vmem:[#allocation9 + $0x144] ss:$16 sps:$4 sm:$0xff]  }
 0x17e   : > { %1169 = vmatprep.subr.bf16.mxu0 %v2491_v9  ;;  %v2588_v9 = vld [vmem:[#allocation9 + $0x14c] ss:$16 sps:$4 sm:$0xff]  }
 0x181   : > { %1170 = vmatpush1.bf16.msra.mxu0 %v2489_v10  ;;  %v2583_v10 = vld [vmem:[#allocation9 + $0x140] ss:$16 sps:$4 sm:$0xff]  }
 0x182   : > { %1171 = vmatprep.subr.bf16.mxu0 %v2497_v11  ;;  %v2586_v11 = vld [vmem:[#allocation9 + $0x148] ss:$16 sps:$4 sm:$0xff]  }
 0x185   : > { %1172 = vmatpush1.bf16.msra.mxu0 %v2495_v12  ;;  %v2591_v12 = vld [vmem:[#allocation9 + $0x164] ss:$16 sps:$4 sm:$0xff]  }
 0x186   : > { %1173 = vmatprep.subr.bf16.mxu0 %v2503_v13  ;;  %v2594_v13 = vld [vmem:[#allocation9 + $0x16c] ss:$16 sps:$4 sm:$0xff]  }
 0x189   : > { %1174 = vmatpush1.bf16.msra.mxu0 %v2501_v14  ;;  %v2589_v14 = vld [vmem:[#allocation9 + $0x160] ss:$16 sps:$4 sm:$0xff]  }
 0x18a   : > { %1175 = vmatprep.subr.bf16.mxu0 %v2509_v15  ;;  %v2592_v15 = vld [vmem:[#allocation9 + $0x168] ss:$16 sps:$4 sm:$0xff]  }
 0x18d   : > { %1176 = vmatpush1.bf16.msra.mxu0 %v2507_v16  ;;  %v2597_v16 = vld [vmem:[#allocation9 + $0x184] ss:$16 sps:$4 sm:$0xff]  }
 0x18e   : > { %1177 = vmatprep.subr.bf16.mxu0 %v2515_v17  ;;  %v2600_v17 = vld [vmem:[#allocation9 + $0x18c] ss:$16 sps:$4 sm:$0xff]  }
 0x191   : > { %1178 = vmatpush1.bf16.msra.mxu0 %v2513_v18  ;;  %v2595_v18 = vld [vmem:[#allocation9 + $0x180] ss:$16 sps:$4 sm:$0xff]  }
 0x192   : > { %1179 = vmatprep.subr.bf16.mxu0 %v2521_v20  ;;  %v2603_v20 = vld [vmem:[#allocation9 + $0x1a4] ss:$16 sps:$4 sm:$0xff]  }
 0x195   : > { %1180 = vmatpush1.bf16.msra.mxu0 %v2519_v21  ;;  %v2601_v21 = vld [vmem:[#allocation9 + $0x1a0] ss:$16 sps:$4 sm:$0xff]  }
 0x196   : > { %1669 = vmatprep.subr.bf16.mxu0 %v2528_v26  ;;  %v2151_v26 = vld [vmem:[%s3448_s2 + $0x8] sm:$0xff] }
 0x22b   : > { %v2253_v27 = vpop.f32.mrb[0].mxu0 }
 0x22c   : > { %v2254_v28 = vpop.f32.mrb[1].mxu0 }
 0x22d   : > { %v2255_v29 = vadd.f32 %v2254_v28, %v2253_v27  ;;  %v2256_v30 = vpop.f32.mrb[2].mxu0  ;;  %v2607_v27 = vld [vmem:[#allocation9 + $0x1c0] ss:$16 sps:$4 sm:$0xff]   ;;  %v2610_v28 = vld [vmem:[#allocation9 + $0x1c8] ss:$16 sps:$4 sm:$0xff]  }
 0x22e   : > { %v2257_v31 = vpop.f32.mrb[3].mxu0  ;;  %v2615_v30 = vld [vmem:[#allocation9 + $0x1e4] ss:$16 sps:$4 sm:$0xff]  }
 0x22f   : > { %v700_v34 = vpack.c.bf16 %v2255_v29, %v2255_v29  ;;  %v1221_v29 = vpack.c.bf16 %v2151_v26, %v2151_v26  ;;  %v2618_v31 = vld [vmem:[#allocation9 + $0x1ec] ss:$16 sps:$4 sm:$0xff]  }
 0x231   : > { %1141 = vmatmul.mubr.bf16.vlgmr.msra.gmra.mrb[0].mxu1 %v700_v34  ;;  %1182 = vmatmul.mubr.bf16.vlgmr.msra.gmra.mrb[4].mxu0 %v700_v34  ;;  %v3331_v34 = vshrl.u32 %v516_v49, 7 }
 0x232   : > { %1629 = vmatpush1.bf16.msra.mxu1 %v2523_v32  ;;  %1670 = vmatpush1.bf16.msra.mxu0 %v2526_v33  ;;  %v2613_v32 = vld [vmem:[#allocation9 + $0x1e0] ss:$16 sps:$4 sm:$0xff]   ;;  %v2616_v33 = vld [vmem:[#allocation9 + $0x1e8] ss:$16 sps:$4 sm:$0xff]  }
 0x233   : > { %1630 = vmatprep.subr.bf16.mxu1 %v2531_v35  ;;  %1671 = vmatprep.subr.bf16.mxu0 %v2534_v36  ;;  %v770_v35 = vsub.s32 0, %v3331_v34  ;;  %v766_v36 = vld [vmem:[#allocation8] sm:$0xf] }
 0x234   : > { %1660 = vmatprep.mubr.bf16.mxu1 %v1221_v29  ;;  %1701 = vmatprep.mubr.bf16.mxu0 %v1221_v29 }
 0x236   : > { %1631 = vmatpush1.bf16.msra.mxu1 %v2529_v37  ;;  %1672 = vmatpush1.bf16.msra.mxu0 %v2532_v38  ;;  %v774_v37 = vsub.s32 1, %v3331_v34  ;;  %v771_v38 = vrot.slane %v766_v36, %v770_v35 }
 0x237   : > { %1632 = vmatprep.subr.bf16.mxu1 %v2537_v39  ;;  %1673 = vmatprep.subr.bf16.mxu0 %v2540_v40 }
 0x238   : > { %v775_v39 = vrot.slane %v766_v36, %v774_v37 }
 0x23a   : > { %1633 = vmatpush1.bf16.msra.mxu1 %v2535_v41  ;;  %1674 = vmatpush1.bf16.msra.mxu0 %v2538_v42  ;;  %v782_v42 = vsub.s32 3, %v3331_v34 }
 0x23b   : > { %1634 = vmatprep.subr.bf16.mxu1 %v2543_v43  ;;  %1675 = vmatprep.subr.bf16.mxu0 %v2546_v44 }
 0x23e   : > { %1635 = vmatpush1.bf16.msra.mxu1 %v2541_v45  ;;  %1676 = vmatpush1.bf16.msra.mxu0 %v2544_v46 }
 0x23f   : > { %1636 = vmatprep.subr.bf16.mxu1 %v2549_v47  ;;  %1677 = vmatprep.subr.bf16.mxu0 %v2552_v48 }
 0x242   : > { %1637 = vmatpush1.bf16.msra.mxu1 %v2547_v50  ;;  %1678 = vmatpush1.bf16.msra.mxu0 %v2550_v51 }
 0x243   : > { %1638 = vmatprep.subr.bf16.mxu1 %v2555_v52  ;;  %1679 = vmatprep.subr.bf16.mxu0 %v2558_v53  ;;  %v783_v53 = vrot.slane %v766_v36, %v782_v42 }
 0x246   : > { %1639 = vmatpush1.bf16.msra.mxu1 %v2553_v54  ;;  %1680 = vmatpush1.bf16.msra.mxu0 %v2556_v55  ;;  %v778_v54 = vsub.s32 2, %v3331_v34 }
 0x247   : > { %1640 = vmatprep.subr.bf16.mxu1 %v2561_v56  ;;  %1681 = vmatprep.subr.bf16.mxu0 %v2564_v57 }
 0x248   : > { %v779_v56 = vrot.slane %v766_v36, %v778_v54 }
 0x24a   : > { %1641 = vmatpush1.bf16.msra.mxu1 %v2559_v58  ;;  %1682 = vmatpush1.bf16.msra.mxu0 %v2562_v59 }
 0x24b   : > { %1642 = vmatprep.subr.bf16.mxu1 %v2567_v60  ;;  %1683 = vmatprep.subr.bf16.mxu0 %v2570_v61 }
 0x24e   : > { %1643 = vmatpush1.bf16.msra.mxu1 %v2565_v62  ;;  %1684 = vmatpush1.bf16.msra.mxu0 %v2568_v63 }
 0x24f   : > { %1644 = vmatprep.subr.bf16.mxu1 %v2573_v0  ;;  %1685 = vmatprep.subr.bf16.mxu0 %v2576_v1  ;;  %v699_v1 = vld [vmem:[%s3497_s19] sm:$0xff] }
 0x252   : > { %1645 = vmatpush1.bf16.msra.mxu1 %v2571_v2  ;;  %1686 = vmatpush1.bf16.msra.mxu0 %v2574_v3 }
 0x253   : > { %1646 = vmatprep.subr.bf16.mxu1 %v2579_v4  ;;  %1687 = vmatprep.subr.bf16.mxu0 %v2582_v5 }
 0x256   : > { %1647 = vmatpush1.bf16.msra.mxu1 %v2577_v6  ;;  %1688 = vmatpush1.bf16.msra.mxu0 %v2580_v7 }
 0x257   : > { %1648 = vmatprep.subr.bf16.mxu1 %v2585_v8  ;;  %1689 = vmatprep.subr.bf16.mxu0 %v2588_v9 }
 0x25a   : > { %1649 = vmatpush1.bf16.msra.mxu1 %v2583_v10  ;;  %1690 = vmatpush1.bf16.msra.mxu0 %v2586_v11 }
 0x25b   : > { %1650 = vmatprep.subr.bf16.mxu1 %v2591_v12  ;;  %1691 = vmatprep.subr.bf16.mxu0 %v2594_v13  ;;  %v1286_v12 = vld [vmem:[#allocation11] sm:$0xf] }
 0x25c   : > { %v1291_v13 = vrot.slane %v1286_v12, %v770_v35  ;;  %v1299_v29 = vrot.slane %v1286_v12, %v778_v54 }
 0x25e   : > { %1651 = vmatpush1.bf16.msra.mxu1 %v2589_v14  ;;  %1692 = vmatpush1.bf16.msra.mxu0 %v2592_v15  ;;  %v1295_v14 = vrot.slane %v1286_v12, %v774_v37 }
 0x25f   : > { %1652 = vmatprep.subr.bf16.mxu1 %v2597_v16  ;;  %1693 = vmatprep.subr.bf16.mxu0 %v2600_v17 }
 0x262   : > { %1653 = vmatpush1.bf16.msra.mxu1 %v2595_v18  ;;  %1694 = vmatpush1.bf16.msra.mxu0 %v2598_v19 }
 0x263   : > { %1654 = vmatprep.subr.bf16.mxu1 %v2603_v20  ;;  %1695 = vmatprep.subr.bf16.mxu0 %v2606_v23 }
 0x266   : > { %1655 = vmatpush1.bf16.msra.mxu1 %v2601_v21  ;;  %1696 = vmatpush1.bf16.msra.mxu0 %v2604_v22 }
 0x267   : > { %1656 = vmatprep.subr.bf16.mxu1 %v2609_v24  ;;  %1697 = vmatprep.subr.bf16.mxu0 %v2612_v25 }
 0x26a   : > { %1657 = vmatpush1.bf16.msra.mxu1 %v2607_v27  ;;  %1698 = vmatpush1.bf16.msra.mxu0 %v2610_v28  ;;  %v1303_v27 = vrot.slane %v1286_v12, %v782_v42 }
 0x26b   : > { %1658 = vmatprep.subr.bf16.mxu1 %v2615_v30  ;;  %1699 = vmatprep.subr.bf16.mxu0 %v2618_v31 }
 0x26e   : > { %1659 = vmatpush1.bf16.msra.mxu1 %v2613_v32  ;;  %1700 = vmatpush1.bf16.msra.mxu0 %v2616_v33 }
 0x304   : > { %v1142_v40 = vpop.f32.mrb[0].mxu1  ;;  %v1183_v41 = vpop.f32.mrb[4].mxu0 }
 0x305   : > { %v1143_v43 = vadd.f32 %v1142_v40, %v771_v38  ;;  %v1144_v44 = vpop.f32.mrb[1].mxu1  ;;  %v1185_v45 = vpop.f32.mrb[5].mxu0  ;;  %v1184_v58 = vadd.f32 %v1183_v41, %v779_v56  ;;  %v2152_v38 = vld [vmem:[%s3497_s19 + $0x8] sm:$0xff] }
 0x306   : > { %v1145_v46 = vadd.f32 %v1144_v44, %v775_v39  ;;  %v1146_v47 = vpop.f32.mrb[2].mxu1  ;;  %v1187_v48 = vpop.f32.mrb[6].mxu0  ;;  %v1186_v55 = vadd.f32 %v1185_v45, %v783_v53 }
 0x307   : > { %v2148_v50 = vmul.f32 -1.442695, %v1143_v43  ;;  %v1147_v49 = vpop.f32.mrb[3].mxu1  ;;  %v1188_v51 = vpop.f32.mrb[7].mxu0 }
 0x308   : > { %v2149_v52 = vmul.f32 -1.442695, %v1145_v46  ;;  %v2150_v57 = vmul.f32 -1.442695, %v1186_v55 }
 0x309   : > { %2619 = vpow2.f32 %v2148_v50 }
 0x30a   : > { %2621 = vpow2.f32 %v2149_v52 }
 0x30b   : > { %2623 = vpow2.f32 %v2150_v57 }
 0x30c   : > { %2625 = vtanh.f32 %v1184_v58 }
 0x313   : > { %v2620_v59 = vpop.eup %2619 }
 0x314   : > { %v2622_v60 = vpop.eup %2621  ;;  %v1193_v61 = vadd.f32 1.0, %v2620_v59 }
 0x315   : > { %v1199_v62 = vadd.f32 1.0, %v2622_v60  ;;  %v2624_v63 = vpop.eup %2623 }
 0x316   : > { %2627 = vrcp.f32 %v1193_v61  ;;  %v2626_v0 = vpop.eup %2625  ;;  %v1206_v5 = vadd.f32 1.0, %v2624_v63 }
 0x317   : > { %2629 = vrcp.f32 %v1199_v62 }
 0x318   : > { %2631 = vrcp.f32 %v1206_v5 }
 0x320   : > { %v2628_v2 = vpop.eup %2627 }
 0x321   : > { %v2630_v3 = vpop.eup %2629  ;;  %v1210_v4 = vmul.f32 %v2628_v2, %v2626_v0 }
 0x322   : > { %v1209_v6 = vmul.f32 %v2630_v3, %v699_v1  ;;  %v2632_v8 = vpop.eup %2631 }
 0x324   : > { %v1211_v7 = vadd.f32 %v1210_v4, %v1209_v6 }
 0x326   : > { %2633 = vtanh.f32 %v1211_v7  ;;  %1215 = vst [vmem:[#allocation17] sm:$0xff] %v1211_v7 }
 0x330   : > { %v2634_v9 = vpop.eup %2633 }
 0x331   : > { %v1213_v10 = vmul.f32 %v2634_v9, %v2632_v8 }
 0x333   : > { %1214 = vst [vmem:[#allocation15] sm:$0xff] %v1213_v10  ;;  %v1220_v11 = vpack.c.bf16 %v1213_v10, %v1213_v10 }
 0x335   : > { %1661 = vmatmul.mubr.bf16.vlgmr.msra.gmra.mrb[4].mxu1 %v1220_v11  ;;  %1702 = vmatmul.mubr.bf16.vlgmr.msra.gmra.mrb[8].mxu0 %v1220_v11 }
 0x408   : > { %v1662_v15 = vpop.f32.mrb[4].mxu1  ;;  %v1703_v16 = vpop.f32.mrb[8].mxu0 }
 0x409   : > { %v1663_v17 = vadd.f32 %v1662_v15, %v1291_v13  ;;  %v1664_v18 = vpop.f32.mrb[5].mxu1  ;;  %v1705_v19 = vpop.f32.mrb[9].mxu0  ;;  %v1704_v31 = vadd.f32 %v1703_v16, %v1299_v29 }
 0x40a   : > { %v1665_v20 = vadd.f32 %v1664_v18, %v1295_v14  ;;  %v1666_v21 = vpop.f32.mrb[6].mxu1  ;;  %v1707_v22 = vpop.f32.mrb[10].mxu0  ;;  %v1706_v28 = vadd.f32 %v1705_v19, %v1303_v27 }
 0x40b   : > { %v2217_v23 = vmul.f32 -1.442695, %v1663_v17  ;;  %v1667_v24 = vpop.f32.mrb[7].mxu1  ;;  %v1708_v25 = vpop.f32.mrb[11].mxu0 }
 0x40c   : > { %v2218_v26 = vmul.f32 -1.442695, %v1665_v20  ;;  %v2219_v30 = vmul.f32 -1.442695, %v1706_v28 }
 0x40d   : > { %2635 = vpow2.f32 %v2217_v23 }
 0x40e   : > { %2637 = vpow2.f32 %v2218_v26 }
 0x40f   : > { %2639 = vpow2.f32 %v2219_v30 }
 0x410   : > { %2641 = vtanh.f32 %v1704_v31 }
 0x417   : > { %v2636_v32 = vpop.eup %2635 }
 0x418   : > { %v2638_v33 = vpop.eup %2637  ;;  %v1713_v34 = vadd.f32 1.0, %v2636_v32 }
 0x419   : > { %v1719_v35 = vadd.f32 1.0, %v2638_v33  ;;  %v2640_v36 = vpop.eup %2639 }
 0x41a   : > { %2643 = vrcp.f32 %v1713_v34  ;;  %v2642_v37 = vpop.eup %2641  ;;  %v1726_v42 = vadd.f32 1.0, %v2640_v36 }
 0x41b   : > { %2645 = vrcp.f32 %v1719_v35 }
 0x41c   : > { %2647 = vrcp.f32 %v1726_v42 }
 0x424   : > { %v2644_v39 = vpop.eup %2643 }
 0x425   : > { %v2646_v40 = vpop.eup %2645  ;;  %v1730_v41 = vmul.f32 %v2644_v39, %v2642_v37 }
 0x426   : > { %v1729_v43 = vmul.f32 %v2646_v40, %v2152_v38  ;;  %v2648_v45 = vpop.eup %2647 }
 0x428   : > { %v1731_v44 = vadd.f32 %v1730_v41, %v1729_v43 }
 0x42a   : > { %2649 = vtanh.f32 %v1731_v44  ;;  %1737 = vst [vmem:[#allocation17 + $0x8] sm:$0xff] %v1731_v44 }
 0x434   : > { %v2650_v46 = vpop.eup %2649 }
 0x435   : > { %v1733_v47 = vmul.f32 %v2650_v46, %v2648_v45 }
 0x437   : > { %1735 = vst [vmem:[#allocation15 + $0x8] sm:$0xff] %v1733_v47  ;;  %1738 = vst [vmem:[#allocation2] sm:$0xff] %v1733_v47 }
 0x438 PF: > { %v2651_v48 = vld [vmem:[%s3301_s30] sm:$0xff]   ;;  %v2978_v50 = vmov 0.0   ;;  %v2652_v49 = vld [vmem:[%s3301_s30 + $0x8] sm:$0xff]   ;;  %vm2979_vm4 = vmmov 0   ;;  %v2653_v51 = vld [vmem:[%s3301_s30 + $0x10] sm:$0xff]   ;;  %s2980_s14 = smov [#allocation15]  }
 0x439   : > { %2268 = vmatprep.subr.bf16.mxu0 %v2978_v50  ;;  %2284 = vmatprep.mubr.msk.bf16.mxu0 %vm2979_vm4, %v2978_v50  ;;  %v2654_v52 = vld [vmem:[%s3301_s30 + $0x18] sm:$0xff]   ;;  %v2655_v53 = vld [vmem:[%s3301_s30 + $0x20] sm:$0xff]   ;;  %v2656_v54 = vld [vmem:[%s3301_s30 + $0x28] sm:$0xff]   ;;  %s1877_s10 = sshll.u32 %s2980_s14, 4  ;;  %p3498_p1 = scmp.eq.s32.totalorder %s3071_s25, 1  ;;  %s1878_s10 = int_to_ptr.vmem [resolvable:$true] %s1877_s10 }
 0x43a   : > { %2269 = vmatpush3.bf16.msra.mxu0 %v2651_v48  ;;  %v2657_v55 = vld [vmem:[%s3301_s30 + $0x30] sm:$0xff]   ;;  %v2658_v56 = vld [vmem:[%s3301_s30 + $0x38] sm:$0xff]   ;;  %s2829_s27 = scalar_lea.vmem %s1878_s10, 256  ;;  %p2836_p3 = scmp.lt.s32.totalorder %s1878_s10, %s1878_s10 }
 0x43b   : > { %2270 = vmatprep.subr.bf16.mxu0 %v2978_v50  ;;  %p2830_p2 = scmp.ne.s32.totalorder %s1878_s10, %s2829_s27  ;;  %p2837_p4 = scmp.lt.s32.totalorder %s2829_s27, %s2829_s27 }
 0x43d   : > { %p2831_p0 = pnand %p2830_p2, %p3498_p1  ;;  %p2838_p9 = por %p2837_p4, %p2836_p3 }
 0x43e   : > { %2271 = vmatpush3.bf16.msra.mxu0 %v2652_v49  ;;  %v1739_v57 = vld [vmem:[#allocation2] sm:$0xff] }
 0x43f   : > { %2272 = vmatprep.subr.bf16.mxu0 %v2978_v50  ;;  %v1740_v58 = vpack.c.bf16 %v1739_v57, %v1739_v57  ;;  %p2832_p10 = pneg %p2831_p0 }
 0x441   : > { %p2839_p6 = pnand %p2838_p9, %p2832_p10 }
 0x442   : > { %2273 = vmatpush3.bf16.msra.mxu0 %v2653_v51 }
 0x443   : > { %2274 = vmatprep.subr.bf16.mxu0 %v2978_v50 }
 0x446   : > { %2275 = vmatpush3.bf16.msra.mxu0 %v2654_v52 }
 0x447   : > { %2276 = vmatprep.subr.bf16.mxu0 %v2978_v50 }
 0x44a   : > { %2277 = vmatpush3.bf16.msra.mxu0 %v2655_v53 }
 0x44b   : > { %2278 = vmatprep.subr.bf16.mxu0 %v2978_v50 }
 0x44e   : > { %2279 = vmatpush3.bf16.msra.mxu0 %v2656_v54 }
 0x44f   : > { %2280 = vmatprep.subr.bf16.mxu0 %v2978_v50 }
 0x452   : > { %2281 = vmatpush3.bf16.msra.mxu0 %v2657_v55 }
 0x453   : > { %2282 = vmatprep.subr.bf16.mxu0 %v2978_v50 }
 0x456   : > { %2283 = vmatpush3.bf16.msra.mxu0 %v2658_v56 }
 0x459   : > { %2285 = vmatmul.mubr.bf16.vlgmr.msra.gmra.mrb[0].mxu0 %v1740_v58 }
 0x45a   : > { %2842 = shalt.err (!%p2839_p6)
}
 0x45b   : > { %s3499_s12 = sld [smem:[#allocation31_spill]]  ;;  %p3500_p12 = pmov %p3498_p1 }
 0x461   : > { %s2843_s15 = scalar_lea.hbm %s3499_s12, 256 }
 0x462   : > { %p2844_p8 = scmp.ne.s32.totalorder %s3499_s12, %s2843_s15  ;;  %p2849_p13 = scmp.lt.u32.totalorder %s2843_s15, %s3499_s12 }
 0x464   : > { %p2845_p11 = pnand %p2844_p8, %p3500_p12 }
 0x466   : > { %p2846_p7 = pneg %p2845_p11 }
 0x468   : > { %p2851_p2 = pnand %p2849_p13, %p2846_p7 }
 0x46a   : > { %2854 = shalt.err (!%p2851_p2)
}
 0x46b   : > { %s2981_s11 = smov 128   ;;  %s2982_s14 = smov 8  }
 0x46c   : > { %2312 = dma.vmem_to_hbm [thread:$0]  (%p3498_p1), %s1878_s10, 256, %s3499_s12, [#allocation16], %s2981_s11, %s2981_s11, %s2982_s14  }
 0x46d   : > { %s2983_s30 = smov [#allocation17]   ;;  %p3501_p10 = pmov %p3498_p1 }
 0x46e   : > { %s1890_s18 = sshll.u32 %s2983_s30, 4  ;;  %s1891_s18 = int_to_ptr.vmem [resolvable:$true] %s1890_s18 }
 0x46f   : > { %s2855_s13 = scalar_lea.vmem %s1891_s18, 256  ;;  %p2862_p9 = scmp.lt.s32.totalorder %s1891_s18, %s1891_s18 }
 0x470   : > { %p2856_p0 = scmp.ne.s32.totalorder %s1891_s18, %s2855_s13  ;;  %p2863_p6 = scmp.lt.s32.totalorder %s2855_s13, %s2855_s13 }
 0x472   : > { %p2857_p3 = pnand %p2856_p0, %p3501_p10  ;;  %p2864_p8 = por %p2863_p6, %p2862_p9 }
 0x474   : > { %p2858_p4 = pneg %p2857_p3 }
 0x476   : > { %p2865_p12 = pnand %p2864_p8, %p2858_p4 }
 0x478   : > { %2868 = shalt.err (!%p2865_p12)
}
 0x479   : > { %s3502_s17 = sld [smem:[#allocation32_spill]]  ;;  %p3503_p7 = pmov %p3498_p1 }
 0x47f   : > { %s2869_s6 = scalar_lea.hbm %s3502_s17, 256 }
 0x480   : > { %p2870_p11 = scmp.ne.s32.totalorder %s3502_s17, %s2869_s6  ;;  %p2875_p1 = scmp.lt.u32.totalorder %s2869_s6, %s3502_s17 }
 0x482   : > { %p2871_p13 = pnand %p2870_p11, %p3503_p7 }
 0x484   : > { %p2872_p2 = pneg %p2871_p13 }
 0x486   : > { %p2877_p0 = pnand %p2875_p1, %p2872_p2 }
 0x488   : > { %2880 = shalt.err (!%p2877_p0)
}
 0x489   : > { %p3504_p10 = pmov %p3503_p7  ;;  %s3505_s27 = scalar_lea.vmem %s3455_s9, %s3310_s28 }
 0x48a   : > { %v2220_v59 = vld [vmem:[%s3505_s27] ss:$0 sm:$0xff]  ;;  %s2230_s6 = sshll.u32 %s3071_s25, 7  ;;  %s1867_s10 = sshll.u32 %s3316_s26, 4  ;;  %s3399_s10 = int_to_ptr.vmem [resolvable:$true] %s1867_s10 }
 0x48b   : > { %2314 = dma.vmem_to_hbm [thread:$0]  (%p3504_p10), %s1891_s18, 256, %s3502_s17, [#allocation16], %s2981_s11, %s2981_s11, %s2982_s14  }
 0x48c   : > { %s3506_s0 = sld [smem:[#allocation30_spill]]  ;;  %s1854_s28 = scalar_lea.sflag [#allocation5], %s3297_s29 }
 0x48d   : > { %s2881_s11 = scalar_lea.vmem %s3399_s10, 128  ;;  %s2984_s14 = smov [#allocation14]  }
 0x48e   : > { %p2882_p3 = scmp.ne.s32.totalorder %s3399_s10, %s2881_s11  ;;  %s2885_s18 = sshll.u32 %s2984_s14, 4  ;;  %s2886_s18 = int_to_ptr.vmem [resolvable:$false] %s2885_s18 }
 0x48f   : > { %s2887_s15 = scalar_lea.vmem %s2886_s18, 256  ;;  %p2888_p6 = scmp.lt.s32.totalorder %s3399_s10, %s2886_s18 }
 0x490   : > { %p2883_p4 = pnand %p2882_p3, %p3235_p5  ;;  %p2889_p8 = scmp.lt.s32.totalorder %s2887_s15, %s2881_s11 }
 0x492   : > { %s3397_s13 = scalar_lea.hbm %s3506_s0, %s2230_s6  ;;  %p2884_p9 = pneg %p2883_p4 }
 0x493   : > { %p2890_p12 = por %p2889_p8, %p2888_p6 }
 0x495   : > { %p2891_p11 = pnand %p2890_p12, %p2884_p9 }
 0x52c   : > { %v1846_v60 = vpop.f32.mrb[0].mxu0 }
 0x52d   : > { %v1847_v61 = vadd.f32 %v2220_v59, %v1846_v60  ;;  %v2286_v62 = vpop.f32.mrb[1].mxu0 }
 0x52e   : > { %v1849_v63 = vpop.f32.mrb[2].mxu0 }
 0x52f   : > { %1852 = vst [vmem:[%s3316_s26] sm:$0xff] %v1847_v61  ;;  %v2287_v0 = vpop.f32.mrb[3].mxu0 }
 0x530   : > { %2894 = shalt.err (!%p2891_p11)
}
 0x531   : > { %s2895_s29 = scalar_lea.hbm %s3397_s13, 128  ;;  %s2899_s27 = scalar_lea.hbm %s3506_s0, 256 }
 0x532   : > { %p2896_p7 = scmp.ne.s32.totalorder %s3397_s13, %s2895_s29  ;;  %p2900_p1 = scmp.lt.u32.totalorder %s3397_s13, %s3506_s0 }
 0x533   : > { %p2901_p0 = scmp.lt.u32.totalorder %s2899_s27, %s2895_s29  ;;  %p2903_p3 = scmp.lt.u32.totalorder %s2895_s29, %s3397_s13 }
 0x534   : > { %p2897_p13 = pnand %p2896_p7, %p3235_p5 }
 0x535   : > { %p2902_p10 = por %p2901_p0, %p2900_p1 }
 0x536   : > { %p2898_p2 = pneg %p2897_p13 }
 0x537   : > { %p2904_p4 = por %p2903_p3, %p2902_p10 }
 0x539   : > { %p2905_p9 = pnand %p2904_p4, %p2898_p2 }
 0x53b   : > { %2908 = shalt.err (!%p2905_p9)
}
 0x53c   : > { %2310 = dma.vmem_to_hbm [thread:$0]  (%p3235_p5), %s3399_s10, 128, %s3397_s13, %s1854_s28  }
 0x53d   : > { %p3507_p6 = scmp.eq.s32.totalorder %s3071_s25, 1 }
 0x53f   : > { %2942 = dma.done.wait (%p3507_p6), [#allocation16], 512   ;;  %p3508_p8 = pmov %p3507_p6 }
 0x541   : > { %2944 = vsyncadd (%p3508_p8), [#allocation16], 4294966784 }
 0x542 PF: > { %s3509_s30 = sld [smem:[#allocation24_spill]]  ;;  %s3510_s11 = sld [smem:[#allocation25_spill]] }
 0x543   : > { %p3512_p11 = scmp.ge.s32.totalorder %s2963_s24, 2 }
 0x548   : > { %s1913_s14 = sand.u32 1, %s3509_s30   ;;  %p3511_p12 = scmp.ne.s32.totalorder %s3510_s11, 0 }
 0x549   : > { %s1914_s18 = scalar_lea.sflag [#allocation5], %s1913_s14 }
 0x54a   : > { %p2341_p7 = pnand %p3512_p11, %p3511_p12 }
 0x54c   : > { %2946 = dma.done.wait (!%p2341_p7), %s1914_s18, 128  }
 0x54d   : > { %2948 = vsyncadd (!%p2341_p7), %s1914_s18, 4294967168  ;;  %s3513_s3 = smov %s3221_s21  ;;  %p30_p5 = scmp.ge.s32.totalorder %s3221_s21, 4  }
 0x54e   : > { %s3514_s21 = smov %s2955_s22  ;;  %s3515_s22 = smov %s2959_s23 }
 0x54f   : > { %s3516_s23 = smov %s3231_s20  ;;  %s3517_s24 = smov %s3513_s3 }
 0x550   :  { %32 = sbr.rel (!%p30_p5) target bundleno = 17 (0x11), region = 153 }
 0x557   :  { %1919 = vsyncpa [#allocation4], 1 }
 0x558   :  { %1921 = vsyncpa [#allocation4 + $0x1], 1 }
 0x559   :  { %1922 = vsyncpa [#allocation7], 1 }
 0x55a   :  { %1923 = vsyncpa [#allocation10], 1 }
 0x55b   :  { %1924 = vsyncpa [#allocation13], 1 }
 0x55c   :  { %1926 = vsyncpa [#allocation13 + $0x1], 1 }
 0x55d   :  { %1927 = vsyncpa [#allocation5], 1 }
 0x55e   :  { %1929 = vsyncpa [#allocation5 + $0x1], 1 }
 0x55f   :  { %1930 = vsyncpa [#allocation16], 1 }

</bundles_post_ra>
